<compile_context>
chip_gen: v6e
topology: v6e:2x2x1
jax: 0.10.0
libtpu: 0.0.40
codegen_flags: <defaults>
</compile_context>

<pallas_src>
import math

import jax
import jax.numpy as jnp
from jax.experimental import pallas as pl
from jax.experimental.pallas import tpu as pltpu


# ---------------------------------------------------------------------------
# In-kernel math helpers
# ---------------------------------------------------------------------------
_PI = math.pi
_TAN_PI_8 = 0.41421356237309503


def _atan2(y, x):
    """Float32-accurate atan2 (octant reduction + Cephes degree-9 polynomial)."""
    ax = jnp.abs(x)
    ay = jnp.abs(y)
    mx = jnp.maximum(ax, ay)
    mn = jnp.minimum(ax, ay)
    a = mn / jnp.maximum(mx, 1e-30)                 # a in [0, 1]
    hi = a > _TAN_PI_8
    z = jnp.where(hi, (a - 1.0) / (a + 1.0), a)     # reduce to |z| <= tan(pi/8)
    zz = z * z
    p = ((8.05374449538e-2 * zz - 1.38776856032e-1) * zz
         + 1.99777106478e-1) * zz - 3.33329491539e-1
    r = p * zz * z + z
    r = jnp.where(hi, r + (_PI / 4.0), r)           # atan(min/max)
    r = jnp.where(ay > ax, (_PI / 2.0) - r, r)      # octant fix
    r = jnp.where(x < 0.0, _PI - r, r)              # quadrant II/III
    return jnp.where(y < 0.0, -r, r)                # sign of y


def _sigmoid(v):
    # exp on EUP + approximate reciprocal on EUP (frees the VPU divide).
    return pl.reciprocal(1.0 + jnp.exp(-v), approx=True)


def _softplus(v):
    # Overflow-safe softplus.
    return jnp.maximum(v, 0.0) + jnp.log(1.0 + jnp.exp(-jnp.abs(v)))


def _conv1d_folded(x, w_ref):
    """PyTorch 'same' Conv1d (cross-correlation) as a single MXU matmul.

    x: (Cin, L) f32.  w_ref: (Cout, K*Cin + 1) Ref holding the PyTorch
    (Cout, Cin, K) weight folded tap-major with the bias in the last column.
    """
    cin, l = x.shape
    ksize = (w_ref.shape[1] - 1) // cin
    pad = ksize // 2
    if pad:
        z = jnp.zeros((cin, pad), x.dtype)
        xp = jnp.concatenate([z, x, z], axis=1)          # pad once
    else:
        xp = x
    rows = [xp[:, k:k + l] for k in range(ksize)]        # static shifted views
    rows.append(jnp.ones((1, l), x.dtype))               # bias row (folded bias)
    stack = jnp.concatenate(rows, axis=0)                # (K*Cin + 1, L)
    return jnp.dot(w_ref[...], stack, preferred_element_type=jnp.float32)


def _conv_relu_conv(x, w1_ref, w2_ref):
    h = jnp.maximum(_conv1d_folded(x, w1_ref), 0.0)
    return _conv1d_folded(h, w2_ref)


# ---------------------------------------------------------------------------
# Fully-fused forward kernel: all SFF blocks + CNNI + UncertaintyHead
# ---------------------------------------------------------------------------
def _make_usffnet_kernel(num_block):
    n_w = 9  # weight operands per SFF block

    def kernel(x_ref, cos_ref, sin_ref, *rest):
        o_ref = rest[-1]
        w = rest[:-1]

        x = x_ref[0]                 # (C, L) slab for this batch sample
        ct = cos_ref[...]            # (L, L) cos(2*pi*n*k/L)
        st = sin_ref[...]            # (L, L) sin(2*pi*n*k/L)
        l = x.shape[1]
        inv_l = 1.0 / float(l)

        feat = x
        for i in range(num_block):
            (spa1, spa2, pha1, pha2, amp1, amp2,
             saw, ca1, ca2) = w[i * n_w:(i + 1) * n_w]

            # ---- SpatialFlow: Conv1d -> ReLU -> Conv1d ---------------------
            spa = _conv_relu_conv(feat, spa1, spa2)

            # ---- FrequencyFlow ---------------------------------------------
            # forward DFT (norm='backward') as two real matmuls
            re = jnp.dot(feat, ct, preferred_element_type=jnp.float32)
            im = -jnp.dot(feat, st, preferred_element_type=jnp.float32)
            amplitude = jnp.sqrt(re * re + im * im)          # torch.abs
            phase = _atan2(im, re)                           # torch.angle
            ref_pha = _conv_relu_conv(phase, pha1, pha2)
            ref_amp = _conv_relu_conv(amplitude, amp1, amp2)
            sr = ref_amp * jnp.cos(ref_pha)                  # make_complex: real
            si = ref_amp * jnp.sin(ref_pha)                  # make_complex: imag
            ire = (jnp.dot(sr, ct, preferred_element_type=jnp.float32)
                   - jnp.dot(si, st, preferred_element_type=jnp.float32))
            iim = (jnp.dot(sr, st, preferred_element_type=jnp.float32)
                   + jnp.dot(si, ct, preferred_element_type=jnp.float32))
            fre = jnp.sqrt(ire * ire + iim * iim) * inv_l    # |ifft|, 1/L norm

            # ---- FusionBlock: SpatialAttention on (fre - spa) --------------
            diff = fre - spa
            avg_c = jnp.mean(diff, axis=0, keepdims=True)    # (1, L)
            max_c = jnp.max(diff, axis=0, keepdims=True)     # (1, L)
            sa_in = jnp.concatenate([avg_c, max_c], axis=0)  # (2, L)
            s = spa + diff * _sigmoid(_conv1d_folded(sa_in, saw))

            # ---- FusionBlock: ChannelAttention on (spa + SA-out) -----------
            avg_l = jnp.mean(s, axis=1, keepdims=True)       # (C, 1)
            max_l = jnp.max(s, axis=1, keepdims=True)        # (C, 1)
            v = jnp.concatenate([avg_l, max_l], axis=1)      # both pools, 1 pass
            v = jnp.concatenate([v, jnp.ones((1, 2), v.dtype)], axis=0)
            h = jnp.maximum(
                jnp.dot(ca1[...], v, preferred_element_type=jnp.float32), 0.0)
            h = jnp.concatenate([h, jnp.ones((1, 2), h.dtype)], axis=0)
            o = jnp.dot(ca2[...], h, preferred_element_type=jnp.float32)
            ca = _sigmoid(o[:, 0:1] + o[:, 1:2])             # (C, 1)

            feat = s * ca + feat                             # SFFBlock residual

        # ---- CNNI (C -> 1 conv) + UncertaintyHead --------------------------
        cnni_w = w[num_block * n_w]
        uh_w = w[num_block * n_w + 1]
        hfeat = _conv1d_folded(feat, cnni_w)                 # (1, L)
        hfeat = jnp.concatenate([hfeat, jnp.ones((1, 1), hfeat.dtype)], axis=1)
        raw = jnp.dot(hfeat, uh_w[...],
                      preferred_element_type=jnp.float32)    # (1, 4)
        sp = _softplus(raw)
        col = jax.lax.broadcasted_iota(jnp.int32, raw.shape, 1)
        # col 0: gamma (raw), 1: nu (softplus), 2: alpha (softplus+1), 3: beta.
        out = jnp.where(col == 0, raw, sp) + jnp.where(col == 2, 1.0, 0.0)
        o_ref[0] = out.astype(o_ref.dtype)

    return kernel


# ---------------------------------------------------------------------------
# Host-side wrapper
# ---------------------------------------------------------------------------
def _dft_tables(l):
    n = jnp.arange(l, dtype=jnp.int32)
    m = (n[:, None] * n[None, :]) % l
    ang = (2.0 * _PI / l) * m.astype(jnp.float32)
    cos_t = jnp.cos(ang)
    sin_t = jnp.sin(ang)
    # Exact zeros where sin is mathematically zero so DC / Nyquist bins keep the
    # same phase convention as torch.angle(torch.fft.fft(x)).
    zero_mask = (m % (l // 2) == 0) if l % 2 == 0 else (m == 0)
    sin_t = jnp.where(zero_mask, 0.0, sin_t)
    return cos_t.astype(jnp.float32), sin_t.astype(jnp.float32)


def usffnet_forward(x, params):
    B, C, L = x.shape
    num_block = len(params["blocks"])
    cos_t, sin_t = _dft_tables(L)

    weights = []
    for blk in params["blocks"]:
        weights.extend(blk)
    weights.append(params["cnni"])
    weights.append(params["uh"])

    in_specs = [
        pl.BlockSpec((1, C, L), lambda b: (b, 0, 0)),        # per-sample slab
        pl.BlockSpec((L, L), lambda b: (0, 0)),              # DFT cos table
        pl.BlockSpec((L, L), lambda b: (0, 0)),              # DFT sin table
    ]
    # Weights: whole-array 2-D blocks, constant index_map -> resident in VMEM.
    for wgt in weights:
        in_specs.append(pl.BlockSpec(wgt.shape, lambda b: (0, 0)))

    out = pl.pallas_call(
        _make_usffnet_kernel(num_block),
        out_shape=jax.ShapeDtypeStruct((B, 1, 4), jnp.float32),
        grid_spec=pltpu.PrefetchScalarGridSpec(
            num_scalar_prefetch=0,
            grid=(B,),   # size-B parallel axis: one sample per TensorCore on v7x
            in_specs=in_specs,
            out_specs=pl.BlockSpec((1, 1, 4), lambda b: (b, 0, 0)),
        ),
        compiler_params=pltpu.CompilerParams(
            dimension_semantics=("parallel",),
        ),
    )(x, cos_t, sin_t, *weights)

    out = out.reshape(B, 4)
    return out[:, 0:1], out[:, 1:2], out[:, 2:3], out[:, 3:4]


# ---------------------------------------------------------------------------
# Parameter init (PyTorch layouts, fan-in uniform bounds) + folding helpers
# ---------------------------------------------------------------------------
def _fold_conv(w_pt, b_pt):
    """PyTorch Conv1d weight (Cout, Cin, K) + bias (Cout,) -> (Cout, K*Cin+1)."""
    cout, cin, k = w_pt.shape
    wf = jnp.transpose(w_pt, (0, 2, 1)).reshape(cout, k * cin)
    return jnp.concatenate([wf, b_pt.reshape(cout, 1)], axis=1)


def _fold_linear(w_pt, b_pt):
    """PyTorch Linear weight (Cout, Cin) + bias (Cout,) -> (Cout, Cin+1)."""
    return jnp.concatenate([w_pt, b_pt.reshape(-1, 1)], axis=1)


def _conv_params(key, cout, cin, k):
    kw, kb = jax.random.split(key)
    bound = 1.0 / math.sqrt(cin * k)
    w = jax.random.uniform(kw, (cout, cin, k), jnp.float32, -bound, bound)
    b = jax.random.uniform(kb, (cout,), jnp.float32, -bound, bound)
    return w, b


def _linear_params(key, cout, cin):
    kw, kb = jax.random.split(key)
    bound = 1.0 / math.sqrt(cin)
    w = jax.random.uniform(kw, (cout, cin), jnp.float32, -bound, bound)
    b = jax.random.uniform(kb, (cout,), jnp.float32, -bound, bound)
    return w, b


def init_params(key, num_block, C, L, mid_list, spa_ks, fre_ks, fus_ks, r):
    blocks = []
    for i in range(num_block):
        key, *ks = jax.random.split(key, 10)
        mid = mid_list[i]
        blk = (
            _fold_conv(*_conv_params(ks[0], mid, C, spa_ks[i])),   # spa conv1
            _fold_conv(*_conv_params(ks[1], C, mid, spa_ks[i])),   # spa conv2
            _fold_conv(*_conv_params(ks[2], mid, C, fre_ks[i])),   # pha conv1
            _fold_conv(*_conv_params(ks[3], C, mid, fre_ks[i])),   # pha conv2
            _fold_conv(*_conv_params(ks[4], mid, C, fre_ks[i])),   # amp conv1
            _fold_conv(*_conv_params(ks[5], C, mid, fre_ks[i])),   # amp conv2
            _fold_conv(*_conv_params(ks[6], 1, 2, fus_ks[i])),     # spatial attn
            _fold_linear(*_linear_params(ks[7], C // r, C)),       # channel fc1
            _fold_linear(*_linear_params(ks[8], C, C // r)),       # channel fc2
        )
        blocks.append(blk)
    key, k1, k2 = jax.random.split(key, 3)
    cnni = _fold_conv(*_conv_params(k1, 1, C, 3))                  # (1, 3C+1)
    uh = _fold_linear(*_linear_params(k2, 4, L)).T                 # (L+1, 4)
    return {"blocks": blocks, "cnni": cnni, "uh": uh}


# ---------------------------------------------------------------------------
if __name__ == "__main__":
    B, C, L = 2, 8, 16                    # batch, feature_num, window_size
    num_block = 2
    mid_channel_list = [8, 8]
    spa_ks_list = [3, 3]
    fre_ks_list = [3, 3]
    fus_ks_list = [3, 3]

    x = jax.random.normal(jax.random.PRNGKey(0), (B, C, L), dtype=jnp.float32)
    params = init_params(jax.random.PRNGKey(42), num_block, C, L,
                         mid_channel_list, spa_ks_list, fre_ks_list,
                         fus_ks_list, r=2)

    fwd = jax.jit(usffnet_forward)
    gamma, nu, alpha, beta = fwd(x, params)
    jax.block_until_ready((gamma, nu, alpha, beta))

    assert gamma.shape == (B, 1) and nu.shape == (B, 1)
    assert alpha.shape == (B, 1) and beta.shape == (B, 1)
    allv = jnp.concatenate([gamma, nu, alpha, beta], axis=1)
    assert bool(jnp.all(jnp.isfinite(allv)))
    assert bool(jnp.all(nu >= 0.0)) and bool(jnp.all(alpha >= 1.0))
    assert bool(jnp.all(beta >= 0.0))
    print("KERNEL_OK")
</pallas_src>

<mosaic_0001>
module attributes {stable_mosaic.version = 11 : i64} {
  func.func @kernel(%arg0: i32, %arg1: memref<1x8x16xf32, #tpu.memory_space<vmem>>, %arg2: memref<16x16xf32, #tpu.memory_space<vmem>>, %arg3: memref<16x16xf32, #tpu.memory_space<vmem>>, %arg4: memref<8x25xf32, #tpu.memory_space<vmem>>, %arg5: memref<8x25xf32, #tpu.memory_space<vmem>>, %arg6: memref<8x25xf32, #tpu.memory_space<vmem>>, %arg7: memref<8x25xf32, #tpu.memory_space<vmem>>, %arg8: memref<8x25xf32, #tpu.memory_space<vmem>>, %arg9: memref<8x25xf32, #tpu.memory_space<vmem>>, %arg10: memref<1x7xf32, #tpu.memory_space<vmem>>, %arg11: memref<4x9xf32, #tpu.memory_space<vmem>>, %arg12: memref<8x5xf32, #tpu.memory_space<vmem>>, %arg13: memref<8x25xf32, #tpu.memory_space<vmem>>, %arg14: memref<8x25xf32, #tpu.memory_space<vmem>>, %arg15: memref<8x25xf32, #tpu.memory_space<vmem>>, %arg16: memref<8x25xf32, #tpu.memory_space<vmem>>, %arg17: memref<8x25xf32, #tpu.memory_space<vmem>>, %arg18: memref<8x25xf32, #tpu.memory_space<vmem>>, %arg19: memref<1x7xf32, #tpu.memory_space<vmem>>, %arg20: memref<4x9xf32, #tpu.memory_space<vmem>>, %arg21: memref<8x5xf32, #tpu.memory_space<vmem>>, %arg22: memref<1x25xf32, #tpu.memory_space<vmem>>, %arg23: memref<17x4xf32, #tpu.memory_space<vmem>>, %arg24: memref<1x1x4xf32, #tpu.memory_space<vmem>>) attributes {dimension_semantics = [#tpu.dimension_semantics<parallel>], iteration_bounds = array<i64: 2>, scalar_prefetch = 0 : i64, scratch_operands = 0 : i64, tpu.core_type = #tpu.core_type<tc>, window_params = [{transform_indices = @transform_0, window_bounds = array<i64: 1, 8, 16>}, {pipeline_mode = #tpu.pipeline_mode<synchronous>, transform_indices = @transform_1, window_bounds = array<i64: 16, 16>}, {pipeline_mode = #tpu.pipeline_mode<synchronous>, transform_indices = @transform_2, window_bounds = array<i64: 16, 16>}, {pipeline_mode = #tpu.pipeline_mode<synchronous>, transform_indices = @transform_3, window_bounds = array<i64: 8, 25>}, {pipeline_mode = #tpu.pipeline_mode<synchronous>, transform_indices = @transform_4, window_bounds = array<i64: 8, 25>}, {pipeline_mode = #tpu.pipeline_mode<synchronous>, transform_indices = @transform_5, window_bounds = array<i64: 8, 25>}, {pipeline_mode = #tpu.pipeline_mode<synchronous>, transform_indices = @transform_6, window_bounds = array<i64: 8, 25>}, {pipeline_mode = #tpu.pipeline_mode<synchronous>, transform_indices = @transform_7, window_bounds = array<i64: 8, 25>}, {pipeline_mode = #tpu.pipeline_mode<synchronous>, transform_indices = @transform_8, window_bounds = array<i64: 8, 25>}, {pipeline_mode = #tpu.pipeline_mode<synchronous>, transform_indices = @transform_9, window_bounds = array<i64: 1, 7>}, {pipeline_mode = #tpu.pipeline_mode<synchronous>, transform_indices = @transform_10, window_bounds = array<i64: 4, 9>}, {pipeline_mode = #tpu.pipeline_mode<synchronous>, transform_indices = @transform_11, window_bounds = array<i64: 8, 5>}, {pipeline_mode = #tpu.pipeline_mode<synchronous>, transform_indices = @transform_12, window_bounds = array<i64: 8, 25>}, {pipeline_mode = #tpu.pipeline_mode<synchronous>, transform_indices = @transform_13, window_bounds = array<i64: 8, 25>}, {pipeline_mode = #tpu.pipeline_mode<synchronous>, transform_indices = @transform_14, window_bounds = array<i64: 8, 25>}, {pipeline_mode = #tpu.pipeline_mode<synchronous>, transform_indices = @transform_15, window_bounds = array<i64: 8, 25>}, {pipeline_mode = #tpu.pipeline_mode<synchronous>, transform_indices = @transform_16, window_bounds = array<i64: 8, 25>}, {pipeline_mode = #tpu.pipeline_mode<synchronous>, transform_indices = @transform_17, window_bounds = array<i64: 8, 25>}, {pipeline_mode = #tpu.pipeline_mode<synchronous>, transform_indices = @transform_18, window_bounds = array<i64: 1, 7>}, {pipeline_mode = #tpu.pipeline_mode<synchronous>, transform_indices = @transform_19, window_bounds = array<i64: 4, 9>}, {pipeline_mode = #tpu.pipeline_mode<synchronous>, transform_indices = @transform_20, window_bounds = array<i64: 8, 5>}, {pipeline_mode = #tpu.pipeline_mode<synchronous>, transform_indices = @transform_21, window_bounds = array<i64: 1, 25>}, {pipeline_mode = #tpu.pipeline_mode<synchronous>, transform_indices = @transform_22, window_bounds = array<i64: 17, 4>}, {transform_indices = @transform_23, window_bounds = array<i64: 1, 1, 4>}]} {
    %c0 = arith.constant 0 : index
    %c0_0 = arith.constant 0 : index
    %c0_1 = arith.constant 0 : index
    %0 = vector.load %arg1[%c0, %c0_0, %c0_1] : memref<1x8x16xf32, #tpu.memory_space<vmem>>, vector<1x8x16xf32>
    %1 = vector.shape_cast %0 : vector<1x8x16xf32> to vector<8x16xf32>
    %c0_2 = arith.constant 0 : index
    %c0_3 = arith.constant 0 : index
    %2 = vector.load %arg2[%c0_2, %c0_3] : memref<16x16xf32, #tpu.memory_space<vmem>>, vector<16x16xf32>
    %c0_4 = arith.constant 0 : index
    %c0_5 = arith.constant 0 : index
    %3 = vector.load %arg3[%c0_4, %c0_5] : memref<16x16xf32, #tpu.memory_space<vmem>>, vector<16x16xf32>
    %cst = arith.constant 0.000000e+00 : f32
    %4 = vector.broadcast %cst : f32 to vector<8x1xf32>
    %5 = tpu.concatenate %4, %1, %4 in 1 : vector<8x1xf32>, vector<8x16xf32>, vector<8x1xf32> -> vector<8x18xf32>
    %6 = vector.extract_strided_slice %5 {offsets = [0, 0], sizes = [8, 16], strides = [1, 1]} : vector<8x18xf32> to vector<8x16xf32>
    %7 = vector.extract_strided_slice %5 {offsets = [0, 1], sizes = [8, 16], strides = [1, 1]} : vector<8x18xf32> to vector<8x16xf32>
    %8 = vector.extract_strided_slice %5 {offsets = [0, 2], sizes = [8, 16], strides = [1, 1]} : vector<8x18xf32> to vector<8x16xf32>
    %cst_6 = arith.constant 1.000000e+00 : f32
    %9 = vector.broadcast %cst_6 : f32 to vector<1x16xf32>
    %10 = tpu.concatenate %6, %7, %8, %9 in 0 : vector<8x16xf32>, vector<8x16xf32>, vector<8x16xf32>, vector<1x16xf32> -> vector<25x16xf32>
    %c0_7 = arith.constant 0 : index
    %c0_8 = arith.constant 0 : index
    %11 = vector.load %arg4[%c0_7, %c0_8] : memref<8x25xf32, #tpu.memory_space<vmem>>, vector<8x25xf32>
    %cst_9 = arith.constant dense<0.000000e+00> : vector<8x16xf32>
    %12 = tpu.matmul %11, %10, %cst_9 {dimension_numbers = #tpu.dot_dimension_numbers<[1], [0], [0], [1], [0, 0, 1, 1], [], []>} : vector<8x25xf32>, vector<25x16xf32>, vector<8x16xf32> -> vector<8x16xf32>
    %cst_10 = arith.constant 0.000000e+00 : f32
    %13 = vector.broadcast %cst_10 : f32 to vector<8x16xf32>
    %14 = arith.maximumf %12, %13 : vector<8x16xf32>
    %cst_11 = arith.constant 0.000000e+00 : f32
    %15 = vector.broadcast %cst_11 : f32 to vector<8x1xf32>
    %16 = tpu.concatenate %15, %14, %15 in 1 : vector<8x1xf32>, vector<8x16xf32>, vector<8x1xf32> -> vector<8x18xf32>
    %17 = vector.extract_strided_slice %16 {offsets = [0, 0], sizes = [8, 16], strides = [1, 1]} : vector<8x18xf32> to vector<8x16xf32>
    %18 = vector.extract_strided_slice %16 {offsets = [0, 1], sizes = [8, 16], strides = [1, 1]} : vector<8x18xf32> to vector<8x16xf32>
    %19 = vector.extract_strided_slice %16 {offsets = [0, 2], sizes = [8, 16], strides = [1, 1]} : vector<8x18xf32> to vector<8x16xf32>
    %cst_12 = arith.constant 1.000000e+00 : f32
    %20 = vector.broadcast %cst_12 : f32 to vector<1x16xf32>
    %21 = tpu.concatenate %17, %18, %19, %20 in 0 : vector<8x16xf32>, vector<8x16xf32>, vector<8x16xf32>, vector<1x16xf32> -> vector<25x16xf32>
    %c0_13 = arith.constant 0 : index
    %c0_14 = arith.constant 0 : index
    %22 = vector.load %arg5[%c0_13, %c0_14] : memref<8x25xf32, #tpu.memory_space<vmem>>, vector<8x25xf32>
    %cst_15 = arith.constant dense<0.000000e+00> : vector<8x16xf32>
    %23 = tpu.matmul %22, %21, %cst_15 {dimension_numbers = #tpu.dot_dimension_numbers<[1], [0], [0], [1], [0, 0, 1, 1], [], []>} : vector<8x25xf32>, vector<25x16xf32>, vector<8x16xf32> -> vector<8x16xf32>
    %cst_16 = arith.constant dense<0.000000e+00> : vector<8x16xf32>
    %24 = tpu.matmul %1, %2, %cst_16 {dimension_numbers = #tpu.dot_dimension_numbers<[1], [0], [0], [1], [0, 0, 1, 1], [], []>} : vector<8x16xf32>, vector<16x16xf32>, vector<8x16xf32> -> vector<8x16xf32>
    %cst_17 = arith.constant dense<0.000000e+00> : vector<8x16xf32>
    %25 = tpu.matmul %1, %3, %cst_17 {dimension_numbers = #tpu.dot_dimension_numbers<[1], [0], [0], [1], [0, 0, 1, 1], [], []>} : vector<8x16xf32>, vector<16x16xf32>, vector<8x16xf32> -> vector<8x16xf32>
    %cst_18 = arith.constant 0.000000e+00 : f32
    %26 = vector.broadcast %cst_18 : f32 to vector<8x16xf32>
    %27 = arith.subf %26, %25 : vector<8x16xf32>
    %28 = arith.mulf %24, %24 : vector<8x16xf32>
    %29 = arith.mulf %27, %27 : vector<8x16xf32>
    %30 = arith.addf %28, %29 : vector<8x16xf32>
    %31 = math.sqrt %30 : vector<8x16xf32>
    %32 = math.absf %24 : vector<8x16xf32>
    %33 = math.absf %27 : vector<8x16xf32>
    %34 = arith.maximumf %32, %33 : vector<8x16xf32>
    %35 = arith.minimumf %32, %33 : vector<8x16xf32>
    %cst_19 = arith.constant 1.000000e-30 : f32
    %36 = vector.broadcast %cst_19 : f32 to vector<8x16xf32>
    %37 = arith.maximumf %34, %36 : vector<8x16xf32>
    %38 = arith.divf %35, %37 : vector<8x16xf32>
    %cst_20 = arith.constant 0.414213568 : f32
    %39 = vector.broadcast %cst_20 : f32 to vector<8x16xf32>
    %40 = arith.cmpf ogt, %38, %39 : vector<8x16xf32>
    %cst_21 = arith.constant 1.000000e+00 : f32
    %41 = vector.broadcast %cst_21 : f32 to vector<8x16xf32>
    %42 = arith.subf %38, %41 : vector<8x16xf32>
    %cst_22 = arith.constant 1.000000e+00 : f32
    %43 = vector.broadcast %cst_22 : f32 to vector<8x16xf32>
    %44 = arith.addf %38, %43 : vector<8x16xf32>
    %45 = arith.divf %42, %44 : vector<8x16xf32>
    %46 = arith.select %40, %45, %38 : vector<8x16xi1>, vector<8x16xf32>
    %47 = arith.mulf %46, %46 : vector<8x16xf32>
    %cst_23 = arith.constant 0.0805374458 : f32
    %48 = vector.broadcast %cst_23 : f32 to vector<8x16xf32>
    %49 = arith.mulf %48, %47 : vector<8x16xf32>
    %cst_24 = arith.constant 0.138776854 : f32
    %50 = vector.broadcast %cst_24 : f32 to vector<8x16xf32>
    %51 = arith.subf %49, %50 : vector<8x16xf32>
    %52 = arith.mulf %51, %47 : vector<8x16xf32>
    %cst_25 = arith.constant 0.199777111 : f32
    %53 = vector.broadcast %cst_25 : f32 to vector<8x16xf32>
    %54 = arith.addf %52, %53 : vector<8x16xf32>
    %55 = arith.mulf %54, %47 : vector<8x16xf32>
    %cst_26 = arith.constant 0.333329499 : f32
    %56 = vector.broadcast %cst_26 : f32 to vector<8x16xf32>
    %57 = arith.subf %55, %56 : vector<8x16xf32>
    %58 = arith.mulf %57, %47 : vector<8x16xf32>
    %59 = arith.mulf %58, %46 : vector<8x16xf32>
    %60 = arith.addf %59, %46 : vector<8x16xf32>
    %cst_27 = arith.constant 0.785398185 : f32
    %61 = vector.broadcast %cst_27 : f32 to vector<8x16xf32>
    %62 = arith.addf %60, %61 : vector<8x16xf32>
    %63 = arith.select %40, %62, %60 : vector<8x16xi1>, vector<8x16xf32>
    %64 = arith.cmpf ogt, %33, %32 : vector<8x16xf32>
    %cst_28 = arith.constant 1.57079637 : f32
    %65 = vector.broadcast %cst_28 : f32 to vector<8x16xf32>
    %66 = arith.subf %65, %63 : vector<8x16xf32>
    %67 = arith.select %64, %66, %63 : vector<8x16xi1>, vector<8x16xf32>
    %cst_29 = arith.constant 0.000000e+00 : f32
    %68 = vector.broadcast %cst_29 : f32 to vector<8x16xf32>
    %69 = arith.cmpf olt, %24, %68 : vector<8x16xf32>
    %cst_30 = arith.constant 3.14159274 : f32
    %70 = vector.broadcast %cst_30 : f32 to vector<8x16xf32>
    %71 = arith.subf %70, %67 : vector<8x16xf32>
    %72 = arith.select %69, %71, %67 : vector<8x16xi1>, vector<8x16xf32>
    %cst_31 = arith.constant 0.000000e+00 : f32
    %73 = vector.broadcast %cst_31 : f32 to vector<8x16xf32>
    %74 = arith.cmpf olt, %27, %73 : vector<8x16xf32>
    %cst_32 = arith.constant 0.000000e+00 : f32
    %75 = vector.broadcast %cst_32 : f32 to vector<8x16xf32>
    %76 = arith.subf %75, %72 : vector<8x16xf32>
    %77 = arith.select %74, %76, %72 : vector<8x16xi1>, vector<8x16xf32>
    %cst_33 = arith.constant 0.000000e+00 : f32
    %78 = vector.broadcast %cst_33 : f32 to vector<8x1xf32>
    %79 = tpu.concatenate %78, %77, %78 in 1 : vector<8x1xf32>, vector<8x16xf32>, vector<8x1xf32> -> vector<8x18xf32>
    %80 = vector.extract_strided_slice %79 {offsets = [0, 0], sizes = [8, 16], strides = [1, 1]} : vector<8x18xf32> to vector<8x16xf32>
    %81 = vector.extract_strided_slice %79 {offsets = [0, 1], sizes = [8, 16], strides = [1, 1]} : vector<8x18xf32> to vector<8x16xf32>
    %82 = vector.extract_strided_slice %79 {offsets = [0, 2], sizes = [8, 16], strides = [1, 1]} : vector<8x18xf32> to vector<8x16xf32>
    %cst_34 = arith.constant 1.000000e+00 : f32
    %83 = vector.broadcast %cst_34 : f32 to vector<1x16xf32>
    %84 = tpu.concatenate %80, %81, %82, %83 in 0 : vector<8x16xf32>, vector<8x16xf32>, vector<8x16xf32>, vector<1x16xf32> -> vector<25x16xf32>
    %c0_35 = arith.constant 0 : index
    %c0_36 = arith.constant 0 : index
    %85 = vector.load %arg6[%c0_35, %c0_36] : memref<8x25xf32, #tpu.memory_space<vmem>>, vector<8x25xf32>
    %cst_37 = arith.constant dense<0.000000e+00> : vector<8x16xf32>
    %86 = tpu.matmul %85, %84, %cst_37 {dimension_numbers = #tpu.dot_dimension_numbers<[1], [0], [0], [1], [0, 0, 1, 1], [], []>} : vector<8x25xf32>, vector<25x16xf32>, vector<8x16xf32> -> vector<8x16xf32>
    %cst_38 = arith.constant 0.000000e+00 : f32
    %87 = vector.broadcast %cst_38 : f32 to vector<8x16xf32>
    %88 = arith.maximumf %86, %87 : vector<8x16xf32>
    %cst_39 = arith.constant 0.000000e+00 : f32
    %89 = vector.broadcast %cst_39 : f32 to vector<8x1xf32>
    %90 = tpu.concatenate %89, %88, %89 in 1 : vector<8x1xf32>, vector<8x16xf32>, vector<8x1xf32> -> vector<8x18xf32>
    %91 = vector.extract_strided_slice %90 {offsets = [0, 0], sizes = [8, 16], strides = [1, 1]} : vector<8x18xf32> to vector<8x16xf32>
    %92 = vector.extract_strided_slice %90 {offsets = [0, 1], sizes = [8, 16], strides = [1, 1]} : vector<8x18xf32> to vector<8x16xf32>
    %93 = vector.extract_strided_slice %90 {offsets = [0, 2], sizes = [8, 16], strides = [1, 1]} : vector<8x18xf32> to vector<8x16xf32>
    %cst_40 = arith.constant 1.000000e+00 : f32
    %94 = vector.broadcast %cst_40 : f32 to vector<1x16xf32>
    %95 = tpu.concatenate %91, %92, %93, %94 in 0 : vector<8x16xf32>, vector<8x16xf32>, vector<8x16xf32>, vector<1x16xf32> -> vector<25x16xf32>
    %c0_41 = arith.constant 0 : index
    %c0_42 = arith.constant 0 : index
    %96 = vector.load %arg7[%c0_41, %c0_42] : memref<8x25xf32, #tpu.memory_space<vmem>>, vector<8x25xf32>
    %cst_43 = arith.constant dense<0.000000e+00> : vector<8x16xf32>
    %97 = tpu.matmul %96, %95, %cst_43 {dimension_numbers = #tpu.dot_dimension_numbers<[1], [0], [0], [1], [0, 0, 1, 1], [], []>} : vector<8x25xf32>, vector<25x16xf32>, vector<8x16xf32> -> vector<8x16xf32>
    %cst_44 = arith.constant 0.000000e+00 : f32
    %98 = vector.broadcast %cst_44 : f32 to vector<8x1xf32>
    %99 = tpu.concatenate %98, %31, %98 in 1 : vector<8x1xf32>, vector<8x16xf32>, vector<8x1xf32> -> vector<8x18xf32>
    %100 = vector.extract_strided_slice %99 {offsets = [0, 0], sizes = [8, 16], strides = [1, 1]} : vector<8x18xf32> to vector<8x16xf32>
    %101 = vector.extract_strided_slice %99 {offsets = [0, 1], sizes = [8, 16], strides = [1, 1]} : vector<8x18xf32> to vector<8x16xf32>
    %102 = vector.extract_strided_slice %99 {offsets = [0, 2], sizes = [8, 16], strides = [1, 1]} : vector<8x18xf32> to vector<8x16xf32>
    %cst_45 = arith.constant 1.000000e+00 : f32
    %103 = vector.broadcast %cst_45 : f32 to vector<1x16xf32>
    %104 = tpu.concatenate %100, %101, %102, %103 in 0 : vector<8x16xf32>, vector<8x16xf32>, vector<8x16xf32>, vector<1x16xf32> -> vector<25x16xf32>
    %c0_46 = arith.constant 0 : index
    %c0_47 = arith.constant 0 : index
    %105 = vector.load %arg8[%c0_46, %c0_47] : memref<8x25xf32, #tpu.memory_space<vmem>>, vector<8x25xf32>
    %cst_48 = arith.constant dense<0.000000e+00> : vector<8x16xf32>
    %106 = tpu.matmul %105, %104, %cst_48 {dimension_numbers = #tpu.dot_dimension_numbers<[1], [0], [0], [1], [0, 0, 1, 1], [], []>} : vector<8x25xf32>, vector<25x16xf32>, vector<8x16xf32> -> vector<8x16xf32>
    %cst_49 = arith.constant 0.000000e+00 : f32
    %107 = vector.broadcast %cst_49 : f32 to vector<8x16xf32>
    %108 = arith.maximumf %106, %107 : vector<8x16xf32>
    %cst_50 = arith.constant 0.000000e+00 : f32
    %109 = vector.broadcast %cst_50 : f32 to vector<8x1xf32>
    %110 = tpu.concatenate %109, %108, %109 in 1 : vector<8x1xf32>, vector<8x16xf32>, vector<8x1xf32> -> vector<8x18xf32>
    %111 = vector.extract_strided_slice %110 {offsets = [0, 0], sizes = [8, 16], strides = [1, 1]} : vector<8x18xf32> to vector<8x16xf32>
    %112 = vector.extract_strided_slice %110 {offsets = [0, 1], sizes = [8, 16], strides = [1, 1]} : vector<8x18xf32> to vector<8x16xf32>
    %113 = vector.extract_strided_slice %110 {offsets = [0, 2], sizes = [8, 16], strides = [1, 1]} : vector<8x18xf32> to vector<8x16xf32>
    %cst_51 = arith.constant 1.000000e+00 : f32
    %114 = vector.broadcast %cst_51 : f32 to vector<1x16xf32>
    %115 = tpu.concatenate %111, %112, %113, %114 in 0 : vector<8x16xf32>, vector<8x16xf32>, vector<8x16xf32>, vector<1x16xf32> -> vector<25x16xf32>
    %c0_52 = arith.constant 0 : index
    %c0_53 = arith.constant 0 : index
    %116 = vector.load %arg9[%c0_52, %c0_53] : memref<8x25xf32, #tpu.memory_space<vmem>>, vector<8x25xf32>
    %cst_54 = arith.constant dense<0.000000e+00> : vector<8x16xf32>
    %117 = tpu.matmul %116, %115, %cst_54 {dimension_numbers = #tpu.dot_dimension_numbers<[1], [0], [0], [1], [0, 0, 1, 1], [], []>} : vector<8x25xf32>, vector<25x16xf32>, vector<8x16xf32> -> vector<8x16xf32>
    %118 = math.cos %97 : vector<8x16xf32>
    %119 = arith.mulf %117, %118 : vector<8x16xf32>
    %120 = math.sin %97 : vector<8x16xf32>
    %121 = arith.mulf %117, %120 : vector<8x16xf32>
    %cst_55 = arith.constant dense<0.000000e+00> : vector<8x16xf32>
    %122 = tpu.matmul %119, %2, %cst_55 {dimension_numbers = #tpu.dot_dimension_numbers<[1], [0], [0], [1], [0, 0, 1, 1], [], []>} : vector<8x16xf32>, vector<16x16xf32>, vector<8x16xf32> -> vector<8x16xf32>
    %cst_56 = arith.constant dense<0.000000e+00> : vector<8x16xf32>
    %123 = tpu.matmul %121, %3, %cst_56 {dimension_numbers = #tpu.dot_dimension_numbers<[1], [0], [0], [1], [0, 0, 1, 1], [], []>} : vector<8x16xf32>, vector<16x16xf32>, vector<8x16xf32> -> vector<8x16xf32>
    %124 = arith.subf %122, %123 : vector<8x16xf32>
    %cst_57 = arith.constant dense<0.000000e+00> : vector<8x16xf32>
    %125 = tpu.matmul %119, %3, %cst_57 {dimension_numbers = #tpu.dot_dimension_numbers<[1], [0], [0], [1], [0, 0, 1, 1], [], []>} : vector<8x16xf32>, vector<16x16xf32>, vector<8x16xf32> -> vector<8x16xf32>
    %cst_58 = arith.constant dense<0.000000e+00> : vector<8x16xf32>
    %126 = tpu.matmul %121, %2, %cst_58 {dimension_numbers = #tpu.dot_dimension_numbers<[1], [0], [0], [1], [0, 0, 1, 1], [], []>} : vector<8x16xf32>, vector<16x16xf32>, vector<8x16xf32> -> vector<8x16xf32>
    %127 = arith.addf %125, %126 : vector<8x16xf32>
    %128 = arith.mulf %124, %124 : vector<8x16xf32>
    %129 = arith.mulf %127, %127 : vector<8x16xf32>
    %130 = arith.addf %128, %129 : vector<8x16xf32>
    %131 = math.sqrt %130 : vector<8x16xf32>
    %cst_59 = arith.constant 6.250000e-02 : f32
    %132 = vector.broadcast %cst_59 : f32 to vector<8x16xf32>
    %133 = arith.mulf %131, %132 : vector<8x16xf32>
    %134 = arith.subf %133, %23 : vector<8x16xf32>
    %cst_60 = arith.constant dense<0.000000e+00> : vector<16xf32>
    %135 = vector.multi_reduction <add>, %134, %cst_60 [0] : vector<8x16xf32> to vector<16xf32>
    %136 = vector.shape_cast %135 : vector<16xf32> to vector<1x16xf32>
    %cst_61 = arith.constant 8.000000e+00 : f32
    %137 = vector.broadcast %cst_61 : f32 to vector<1x16xf32>
    %138 = arith.divf %136, %137 : vector<1x16xf32>
    %cst_62 = arith.constant dense<0xFF800000> : vector<16xf32>
    %139 = vector.multi_reduction <maximumf>, %134, %cst_62 [0] : vector<8x16xf32> to vector<16xf32>
    %140 = vector.shape_cast %139 : vector<16xf32> to vector<1x16xf32>
    %141 = tpu.concatenate %138, %140 in 0 : vector<1x16xf32>, vector<1x16xf32> -> vector<2x16xf32>
    %cst_63 = arith.constant 0.000000e+00 : f32
    %142 = vector.broadcast %cst_63 : f32 to vector<2x1xf32>
    %143 = tpu.concatenate %142, %141, %142 in 1 : vector<2x1xf32>, vector<2x16xf32>, vector<2x1xf32> -> vector<2x18xf32>
    %144 = vector.extract_strided_slice %143 {offsets = [0, 0], sizes = [2, 16], strides = [1, 1]} : vector<2x18xf32> to vector<2x16xf32>
    %145 = vector.extract_strided_slice %143 {offsets = [0, 1], sizes = [2, 16], strides = [1, 1]} : vector<2x18xf32> to vector<2x16xf32>
    %146 = vector.extract_strided_slice %143 {offsets = [0, 2], sizes = [2, 16], strides = [1, 1]} : vector<2x18xf32> to vector<2x16xf32>
    %cst_64 = arith.constant 1.000000e+00 : f32
    %147 = vector.broadcast %cst_64 : f32 to vector<1x16xf32>
    %148 = tpu.concatenate %144, %145, %146, %147 in 0 : vector<2x16xf32>, vector<2x16xf32>, vector<2x16xf32>, vector<1x16xf32> -> vector<7x16xf32>
    %c0_65 = arith.constant 0 : index
    %c0_66 = arith.constant 0 : index
    %149 = vector.load %arg10[%c0_65, %c0_66] : memref<1x7xf32, #tpu.memory_space<vmem>>, vector<1x7xf32>
    %cst_67 = arith.constant dense<0.000000e+00> : vector<1x16xf32>
    %150 = tpu.matmul %149, %148, %cst_67 {dimension_numbers = #tpu.dot_dimension_numbers<[1], [0], [0], [1], [0, 0, 1, 1], [], []>} : vector<1x7xf32>, vector<7x16xf32>, vector<1x16xf32> -> vector<1x16xf32>
    %cst_68 = arith.constant 0.000000e+00 : f32
    %151 = vector.broadcast %cst_68 : f32 to vector<1x16xf32>
    %152 = arith.subf %151, %150 : vector<1x16xf32>
    %153 = math.exp %152 : vector<1x16xf32>
    %cst_69 = arith.constant 1.000000e+00 : f32
    %154 = vector.broadcast %cst_69 : f32 to vector<1x16xf32>
    %155 = arith.addf %154, %153 : vector<1x16xf32>
    %156 = tpu.reciprocal %155 {approx = true} : vector<1x16xf32> -> vector<1x16xf32>
    %157 = vector.broadcast %156 : vector<1x16xf32> to vector<8x16xf32>
    %158 = arith.mulf %134, %157 : vector<8x16xf32>
    %159 = arith.addf %23, %158 : vector<8x16xf32>
    %cst_70 = arith.constant dense<0.000000e+00> : vector<8xf32>
    %160 = vector.multi_reduction <add>, %159, %cst_70 [1] : vector<8x16xf32> to vector<8xf32>
    %161 = vector.shape_cast %160 : vector<8xf32> to vector<8x1xf32>
    %cst_71 = arith.constant 1.600000e+01 : f32
    %162 = vector.broadcast %cst_71 : f32 to vector<8x1xf32>
    %163 = arith.divf %161, %162 : vector<8x1xf32>
    %cst_72 = arith.constant dense<0xFF800000> : vector<8xf32>
    %164 = vector.multi_reduction <maximumf>, %159, %cst_72 [1] : vector<8x16xf32> to vector<8xf32>
    %165 = vector.shape_cast %164 : vector<8xf32> to vector<8x1xf32>
    %166 = tpu.concatenate %163, %165 in 1 : vector<8x1xf32>, vector<8x1xf32> -> vector<8x2xf32>
    %cst_73 = arith.constant 1.000000e+00 : f32
    %167 = vector.broadcast %cst_73 : f32 to vector<1x2xf32>
    %168 = tpu.concatenate %166, %167 in 0 : vector<8x2xf32>, vector<1x2xf32> -> vector<9x2xf32>
    %c0_74 = arith.constant 0 : index
    %c0_75 = arith.constant 0 : index
    %169 = vector.load %arg11[%c0_74, %c0_75] : memref<4x9xf32, #tpu.memory_space<vmem>>, vector<4x9xf32>
    %cst_76 = arith.constant dense<0.000000e+00> : vector<4x2xf32>
    %170 = tpu.matmul %169, %168, %cst_76 {dimension_numbers = #tpu.dot_dimension_numbers<[1], [0], [0], [1], [0, 0, 1, 1], [], []>} : vector<4x9xf32>, vector<9x2xf32>, vector<4x2xf32> -> vector<4x2xf32>
    %cst_77 = arith.constant 0.000000e+00 : f32
    %171 = vector.broadcast %cst_77 : f32 to vector<4x2xf32>
    %172 = arith.maximumf %170, %171 : vector<4x2xf32>
    %cst_78 = arith.constant 1.000000e+00 : f32
    %173 = vector.broadcast %cst_78 : f32 to vector<1x2xf32>
    %174 = tpu.concatenate %172, %173 in 0 : vector<4x2xf32>, vector<1x2xf32> -> vector<5x2xf32>
    %c0_79 = arith.constant 0 : index
    %c0_80 = arith.constant 0 : index
    %175 = vector.load %arg12[%c0_79, %c0_80] : memref<8x5xf32, #tpu.memory_space<vmem>>, vector<8x5xf32>
    %cst_81 = arith.constant dense<0.000000e+00> : vector<8x2xf32>
    %176 = tpu.matmul %175, %174, %cst_81 {dimension_numbers = #tpu.dot_dimension_numbers<[1], [0], [0], [1], [0, 0, 1, 1], [], []>} : vector<8x5xf32>, vector<5x2xf32>, vector<8x2xf32> -> vector<8x2xf32>
    %177 = vector.extract_strided_slice %176 {offsets = [0, 0], sizes = [8, 1], strides = [1, 1]} : vector<8x2xf32> to vector<8x1xf32>
    %178 = vector.extract_strided_slice %176 {offsets = [0, 1], sizes = [8, 1], strides = [1, 1]} : vector<8x2xf32> to vector<8x1xf32>
    %179 = arith.addf %177, %178 : vector<8x1xf32>
    %cst_82 = arith.constant 0.000000e+00 : f32
    %180 = vector.broadcast %cst_82 : f32 to vector<8x1xf32>
    %181 = arith.subf %180, %179 : vector<8x1xf32>
    %182 = math.exp %181 : vector<8x1xf32>
    %cst_83 = arith.constant 1.000000e+00 : f32
    %183 = vector.broadcast %cst_83 : f32 to vector<8x1xf32>
    %184 = arith.addf %183, %182 : vector<8x1xf32>
    %185 = tpu.reciprocal %184 {approx = true} : vector<8x1xf32> -> vector<8x1xf32>
    %186 = vector.broadcast %185 : vector<8x1xf32> to vector<8x16xf32>
    %187 = arith.mulf %159, %186 : vector<8x16xf32>
    %188 = arith.addf %187, %1 : vector<8x16xf32>
    %cst_84 = arith.constant 0.000000e+00 : f32
    %189 = vector.broadcast %cst_84 : f32 to vector<8x1xf32>
    %190 = tpu.concatenate %189, %188, %189 in 1 : vector<8x1xf32>, vector<8x16xf32>, vector<8x1xf32> -> vector<8x18xf32>
    %191 = vector.extract_strided_slice %190 {offsets = [0, 0], sizes = [8, 16], strides = [1, 1]} : vector<8x18xf32> to vector<8x16xf32>
    %192 = vector.extract_strided_slice %190 {offsets = [0, 1], sizes = [8, 16], strides = [1, 1]} : vector<8x18xf32> to vector<8x16xf32>
    %193 = vector.extract_strided_slice %190 {offsets = [0, 2], sizes = [8, 16], strides = [1, 1]} : vector<8x18xf32> to vector<8x16xf32>
    %cst_85 = arith.constant 1.000000e+00 : f32
    %194 = vector.broadcast %cst_85 : f32 to vector<1x16xf32>
    %195 = tpu.concatenate %191, %192, %193, %194 in 0 : vector<8x16xf32>, vector<8x16xf32>, vector<8x16xf32>, vector<1x16xf32> -> vector<25x16xf32>
    %c0_86 = arith.constant 0 : index
    %c0_87 = arith.constant 0 : index
    %196 = vector.load %arg13[%c0_86, %c0_87] : memref<8x25xf32, #tpu.memory_space<vmem>>, vector<8x25xf32>
    %cst_88 = arith.constant dense<0.000000e+00> : vector<8x16xf32>
    %197 = tpu.matmul %196, %195, %cst_88 {dimension_numbers = #tpu.dot_dimension_numbers<[1], [0], [0], [1], [0, 0, 1, 1], [], []>} : vector<8x25xf32>, vector<25x16xf32>, vector<8x16xf32> -> vector<8x16xf32>
    %cst_89 = arith.constant 0.000000e+00 : f32
    %198 = vector.broadcast %cst_89 : f32 to vector<8x16xf32>
    %199 = arith.maximumf %197, %198 : vector<8x16xf32>
    %cst_90 = arith.constant 0.000000e+00 : f32
    %200 = vector.broadcast %cst_90 : f32 to vector<8x1xf32>
    %201 = tpu.concatenate %200, %199, %200 in 1 : vector<8x1xf32>, vector<8x16xf32>, vector<8x1xf32> -> vector<8x18xf32>
    %202 = vector.extract_strided_slice %201 {offsets = [0, 0], sizes = [8, 16], strides = [1, 1]} : vector<8x18xf32> to vector<8x16xf32>
    %203 = vector.extract_strided_slice %201 {offsets = [0, 1], sizes = [8, 16], strides = [1, 1]} : vector<8x18xf32> to vector<8x16xf32>
    %204 = vector.extract_strided_slice %201 {offsets = [0, 2], sizes = [8, 16], strides = [1, 1]} : vector<8x18xf32> to vector<8x16xf32>
    %cst_91 = arith.constant 1.000000e+00 : f32
    %205 = vector.broadcast %cst_91 : f32 to vector<1x16xf32>
    %206 = tpu.concatenate %202, %203, %204, %205 in 0 : vector<8x16xf32>, vector<8x16xf32>, vector<8x16xf32>, vector<1x16xf32> -> vector<25x16xf32>
    %c0_92 = arith.constant 0 : index
    %c0_93 = arith.constant 0 : index
    %207 = vector.load %arg14[%c0_92, %c0_93] : memref<8x25xf32, #tpu.memory_space<vmem>>, vector<8x25xf32>
    %cst_94 = arith.constant dense<0.000000e+00> : vector<8x16xf32>
    %208 = tpu.matmul %207, %206, %cst_94 {dimension_numbers = #tpu.dot_dimension_numbers<[1], [0], [0], [1], [0, 0, 1, 1], [], []>} : vector<8x25xf32>, vector<25x16xf32>, vector<8x16xf32> -> vector<8x16xf32>
    %cst_95 = arith.constant dense<0.000000e+00> : vector<8x16xf32>
    %209 = tpu.matmul %188, %2, %cst_95 {dimension_numbers = #tpu.dot_dimension_numbers<[1], [0], [0], [1], [0, 0, 1, 1], [], []>} : vector<8x16xf32>, vector<16x16xf32>, vector<8x16xf32> -> vector<8x16xf32>
    %cst_96 = arith.constant dense<0.000000e+00> : vector<8x16xf32>
    %210 = tpu.matmul %188, %3, %cst_96 {dimension_numbers = #tpu.dot_dimension_numbers<[1], [0], [0], [1], [0, 0, 1, 1], [], []>} : vector<8x16xf32>, vector<16x16xf32>, vector<8x16xf32> -> vector<8x16xf32>
    %cst_97 = arith.constant 0.000000e+00 : f32
    %211 = vector.broadcast %cst_97 : f32 to vector<8x16xf32>
    %212 = arith.subf %211, %210 : vector<8x16xf32>
    %213 = arith.mulf %209, %209 : vector<8x16xf32>
    %214 = arith.mulf %212, %212 : vector<8x16xf32>
    %215 = arith.addf %213, %214 : vector<8x16xf32>
    %216 = math.sqrt %215 : vector<8x16xf32>
    %217 = math.absf %209 : vector<8x16xf32>
    %218 = math.absf %212 : vector<8x16xf32>
    %219 = arith.maximumf %217, %218 : vector<8x16xf32>
    %220 = arith.minimumf %217, %218 : vector<8x16xf32>
    %cst_98 = arith.constant 1.000000e-30 : f32
    %221 = vector.broadcast %cst_98 : f32 to vector<8x16xf32>
    %222 = arith.maximumf %219, %221 : vector<8x16xf32>
    %223 = arith.divf %220, %222 : vector<8x16xf32>
    %cst_99 = arith.constant 0.414213568 : f32
    %224 = vector.broadcast %cst_99 : f32 to vector<8x16xf32>
    %225 = arith.cmpf ogt, %223, %224 : vector<8x16xf32>
    %cst_100 = arith.constant 1.000000e+00 : f32
    %226 = vector.broadcast %cst_100 : f32 to vector<8x16xf32>
    %227 = arith.subf %223, %226 : vector<8x16xf32>
    %cst_101 = arith.constant 1.000000e+00 : f32
    %228 = vector.broadcast %cst_101 : f32 to vector<8x16xf32>
    %229 = arith.addf %223, %228 : vector<8x16xf32>
    %230 = arith.divf %227, %229 : vector<8x16xf32>
    %231 = arith.select %225, %230, %223 : vector<8x16xi1>, vector<8x16xf32>
    %232 = arith.mulf %231, %231 : vector<8x16xf32>
    %cst_102 = arith.constant 0.0805374458 : f32
    %233 = vector.broadcast %cst_102 : f32 to vector<8x16xf32>
    %234 = arith.mulf %233, %232 : vector<8x16xf32>
    %cst_103 = arith.constant 0.138776854 : f32
    %235 = vector.broadcast %cst_103 : f32 to vector<8x16xf32>
    %236 = arith.subf %234, %235 : vector<8x16xf32>
    %237 = arith.mulf %236, %232 : vector<8x16xf32>
    %cst_104 = arith.constant 0.199777111 : f32
    %238 = vector.broadcast %cst_104 : f32 to vector<8x16xf32>
    %239 = arith.addf %237, %238 : vector<8x16xf32>
    %240 = arith.mulf %239, %232 : vector<8x16xf32>
    %cst_105 = arith.constant 0.333329499 : f32
    %241 = vector.broadcast %cst_105 : f32 to vector<8x16xf32>
    %242 = arith.subf %240, %241 : vector<8x16xf32>
    %243 = arith.mulf %242, %232 : vector<8x16xf32>
    %244 = arith.mulf %243, %231 : vector<8x16xf32>
    %245 = arith.addf %244, %231 : vector<8x16xf32>
    %cst_106 = arith.constant 0.785398185 : f32
    %246 = vector.broadcast %cst_106 : f32 to vector<8x16xf32>
    %247 = arith.addf %245, %246 : vector<8x16xf32>
    %248 = arith.select %225, %247, %245 : vector<8x16xi1>, vector<8x16xf32>
    %249 = arith.cmpf ogt, %218, %217 : vector<8x16xf32>
    %cst_107 = arith.constant 1.57079637 : f32
    %250 = vector.broadcast %cst_107 : f32 to vector<8x16xf32>
    %251 = arith.subf %250, %248 : vector<8x16xf32>
    %252 = arith.select %249, %251, %248 : vector<8x16xi1>, vector<8x16xf32>
    %cst_108 = arith.constant 0.000000e+00 : f32
    %253 = vector.broadcast %cst_108 : f32 to vector<8x16xf32>
    %254 = arith.cmpf olt, %209, %253 : vector<8x16xf32>
    %cst_109 = arith.constant 3.14159274 : f32
    %255 = vector.broadcast %cst_109 : f32 to vector<8x16xf32>
    %256 = arith.subf %255, %252 : vector<8x16xf32>
    %257 = arith.select %254, %256, %252 : vector<8x16xi1>, vector<8x16xf32>
    %cst_110 = arith.constant 0.000000e+00 : f32
    %258 = vector.broadcast %cst_110 : f32 to vector<8x16xf32>
    %259 = arith.cmpf olt, %212, %258 : vector<8x16xf32>
    %cst_111 = arith.constant 0.000000e+00 : f32
    %260 = vector.broadcast %cst_111 : f32 to vector<8x16xf32>
    %261 = arith.subf %260, %257 : vector<8x16xf32>
    %262 = arith.select %259, %261, %257 : vector<8x16xi1>, vector<8x16xf32>
    %cst_112 = arith.constant 0.000000e+00 : f32
    %263 = vector.broadcast %cst_112 : f32 to vector<8x1xf32>
    %264 = tpu.concatenate %263, %262, %263 in 1 : vector<8x1xf32>, vector<8x16xf32>, vector<8x1xf32> -> vector<8x18xf32>
    %265 = vector.extract_strided_slice %264 {offsets = [0, 0], sizes = [8, 16], strides = [1, 1]} : vector<8x18xf32> to vector<8x16xf32>
    %266 = vector.extract_strided_slice %264 {offsets = [0, 1], sizes = [8, 16], strides = [1, 1]} : vector<8x18xf32> to vector<8x16xf32>
    %267 = vector.extract_strided_slice %264 {offsets = [0, 2], sizes = [8, 16], strides = [1, 1]} : vector<8x18xf32> to vector<8x16xf32>
    %cst_113 = arith.constant 1.000000e+00 : f32
    %268 = vector.broadcast %cst_113 : f32 to vector<1x16xf32>
    %269 = tpu.concatenate %265, %266, %267, %268 in 0 : vector<8x16xf32>, vector<8x16xf32>, vector<8x16xf32>, vector<1x16xf32> -> vector<25x16xf32>
    %c0_114 = arith.constant 0 : index
    %c0_115 = arith.constant 0 : index
    %270 = vector.load %arg15[%c0_114, %c0_115] : memref<8x25xf32, #tpu.memory_space<vmem>>, vector<8x25xf32>
    %cst_116 = arith.constant dense<0.000000e+00> : vector<8x16xf32>
    %271 = tpu.matmul %270, %269, %cst_116 {dimension_numbers = #tpu.dot_dimension_numbers<[1], [0], [0], [1], [0, 0, 1, 1], [], []>} : vector<8x25xf32>, vector<25x16xf32>, vector<8x16xf32> -> vector<8x16xf32>
    %cst_117 = arith.constant 0.000000e+00 : f32
    %272 = vector.broadcast %cst_117 : f32 to vector<8x16xf32>
    %273 = arith.maximumf %271, %272 : vector<8x16xf32>
    %cst_118 = arith.constant 0.000000e+00 : f32
    %274 = vector.broadcast %cst_118 : f32 to vector<8x1xf32>
    %275 = tpu.concatenate %274, %273, %274 in 1 : vector<8x1xf32>, vector<8x16xf32>, vector<8x1xf32> -> vector<8x18xf32>
    %276 = vector.extract_strided_slice %275 {offsets = [0, 0], sizes = [8, 16], strides = [1, 1]} : vector<8x18xf32> to vector<8x16xf32>
    %277 = vector.extract_strided_slice %275 {offsets = [0, 1], sizes = [8, 16], strides = [1, 1]} : vector<8x18xf32> to vector<8x16xf32>
    %278 = vector.extract_strided_slice %275 {offsets = [0, 2], sizes = [8, 16], strides = [1, 1]} : vector<8x18xf32> to vector<8x16xf32>
    %cst_119 = arith.constant 1.000000e+00 : f32
    %279 = vector.broadcast %cst_119 : f32 to vector<1x16xf32>
    %280 = tpu.concatenate %276, %277, %278, %279 in 0 : vector<8x16xf32>, vector<8x16xf32>, vector<8x16xf32>, vector<1x16xf32> -> vector<25x16xf32>
    %c0_120 = arith.constant 0 : index
    %c0_121 = arith.constant 0 : index
    %281 = vector.load %arg16[%c0_120, %c0_121] : memref<8x25xf32, #tpu.memory_space<vmem>>, vector<8x25xf32>
    %cst_122 = arith.constant dense<0.000000e+00> : vector<8x16xf32>
    %282 = tpu.matmul %281, %280, %cst_122 {dimension_numbers = #tpu.dot_dimension_numbers<[1], [0], [0], [1], [0, 0, 1, 1], [], []>} : vector<8x25xf32>, vector<25x16xf32>, vector<8x16xf32> -> vector<8x16xf32>
    %cst_123 = arith.constant 0.000000e+00 : f32
    %283 = vector.broadcast %cst_123 : f32 to vector<8x1xf32>
    %284 = tpu.concatenate %283, %216, %283 in 1 : vector<8x1xf32>, vector<8x16xf32>, vector<8x1xf32> -> vector<8x18xf32>
    %285 = vector.extract_strided_slice %284 {offsets = [0, 0], sizes = [8, 16], strides = [1, 1]} : vector<8x18xf32> to vector<8x16xf32>
    %286 = vector.extract_strided_slice %284 {offsets = [0, 1], sizes = [8, 16], strides = [1, 1]} : vector<8x18xf32> to vector<8x16xf32>
    %287 = vector.extract_strided_slice %284 {offsets = [0, 2], sizes = [8, 16], strides = [1, 1]} : vector<8x18xf32> to vector<8x16xf32>
    %cst_124 = arith.constant 1.000000e+00 : f32
    %288 = vector.broadcast %cst_124 : f32 to vector<1x16xf32>
    %289 = tpu.concatenate %285, %286, %287, %288 in 0 : vector<8x16xf32>, vector<8x16xf32>, vector<8x16xf32>, vector<1x16xf32> -> vector<25x16xf32>
    %c0_125 = arith.constant 0 : index
    %c0_126 = arith.constant 0 : index
    %290 = vector.load %arg17[%c0_125, %c0_126] : memref<8x25xf32, #tpu.memory_space<vmem>>, vector<8x25xf32>
    %cst_127 = arith.constant dense<0.000000e+00> : vector<8x16xf32>
    %291 = tpu.matmul %290, %289, %cst_127 {dimension_numbers = #tpu.dot_dimension_numbers<[1], [0], [0], [1], [0, 0, 1, 1], [], []>} : vector<8x25xf32>, vector<25x16xf32>, vector<8x16xf32> -> vector<8x16xf32>
    %cst_128 = arith.constant 0.000000e+00 : f32
    %292 = vector.broadcast %cst_128 : f32 to vector<8x16xf32>
    %293 = arith.maximumf %291, %292 : vector<8x16xf32>
    %cst_129 = arith.constant 0.000000e+00 : f32
    %294 = vector.broadcast %cst_129 : f32 to vector<8x1xf32>
    %295 = tpu.concatenate %294, %293, %294 in 1 : vector<8x1xf32>, vector<8x16xf32>, vector<8x1xf32> -> vector<8x18xf32>
    %296 = vector.extract_strided_slice %295 {offsets = [0, 0], sizes = [8, 16], strides = [1, 1]} : vector<8x18xf32> to vector<8x16xf32>
    %297 = vector.extract_strided_slice %295 {offsets = [0, 1], sizes = [8, 16], strides = [1, 1]} : vector<8x18xf32> to vector<8x16xf32>
    %298 = vector.extract_strided_slice %295 {offsets = [0, 2], sizes = [8, 16], strides = [1, 1]} : vector<8x18xf32> to vector<8x16xf32>
    %cst_130 = arith.constant 1.000000e+00 : f32
    %299 = vector.broadcast %cst_130 : f32 to vector<1x16xf32>
    %300 = tpu.concatenate %296, %297, %298, %299 in 0 : vector<8x16xf32>, vector<8x16xf32>, vector<8x16xf32>, vector<1x16xf32> -> vector<25x16xf32>
    %c0_131 = arith.constant 0 : index
    %c0_132 = arith.constant 0 : index
    %301 = vector.load %arg18[%c0_131, %c0_132] : memref<8x25xf32, #tpu.memory_space<vmem>>, vector<8x25xf32>
    %cst_133 = arith.constant dense<0.000000e+00> : vector<8x16xf32>
    %302 = tpu.matmul %301, %300, %cst_133 {dimension_numbers = #tpu.dot_dimension_numbers<[1], [0], [0], [1], [0, 0, 1, 1], [], []>} : vector<8x25xf32>, vector<25x16xf32>, vector<8x16xf32> -> vector<8x16xf32>
    %303 = math.cos %282 : vector<8x16xf32>
    %304 = arith.mulf %302, %303 : vector<8x16xf32>
    %305 = math.sin %282 : vector<8x16xf32>
    %306 = arith.mulf %302, %305 : vector<8x16xf32>
    %cst_134 = arith.constant dense<0.000000e+00> : vector<8x16xf32>
    %307 = tpu.matmul %304, %2, %cst_134 {dimension_numbers = #tpu.dot_dimension_numbers<[1], [0], [0], [1], [0, 0, 1, 1], [], []>} : vector<8x16xf32>, vector<16x16xf32>, vector<8x16xf32> -> vector<8x16xf32>
    %cst_135 = arith.constant dense<0.000000e+00> : vector<8x16xf32>
    %308 = tpu.matmul %306, %3, %cst_135 {dimension_numbers = #tpu.dot_dimension_numbers<[1], [0], [0], [1], [0, 0, 1, 1], [], []>} : vector<8x16xf32>, vector<16x16xf32>, vector<8x16xf32> -> vector<8x16xf32>
    %309 = arith.subf %307, %308 : vector<8x16xf32>
    %cst_136 = arith.constant dense<0.000000e+00> : vector<8x16xf32>
    %310 = tpu.matmul %304, %3, %cst_136 {dimension_numbers = #tpu.dot_dimension_numbers<[1], [0], [0], [1], [0, 0, 1, 1], [], []>} : vector<8x16xf32>, vector<16x16xf32>, vector<8x16xf32> -> vector<8x16xf32>
    %cst_137 = arith.constant dense<0.000000e+00> : vector<8x16xf32>
    %311 = tpu.matmul %306, %2, %cst_137 {dimension_numbers = #tpu.dot_dimension_numbers<[1], [0], [0], [1], [0, 0, 1, 1], [], []>} : vector<8x16xf32>, vector<16x16xf32>, vector<8x16xf32> -> vector<8x16xf32>
    %312 = arith.addf %310, %311 : vector<8x16xf32>
    %313 = arith.mulf %309, %309 : vector<8x16xf32>
    %314 = arith.mulf %312, %312 : vector<8x16xf32>
    %315 = arith.addf %313, %314 : vector<8x16xf32>
    %316 = math.sqrt %315 : vector<8x16xf32>
    %cst_138 = arith.constant 6.250000e-02 : f32
    %317 = vector.broadcast %cst_138 : f32 to vector<8x16xf32>
    %318 = arith.mulf %316, %317 : vector<8x16xf32>
    %319 = arith.subf %318, %208 : vector<8x16xf32>
    %cst_139 = arith.constant dense<0.000000e+00> : vector<16xf32>
    %320 = vector.multi_reduction <add>, %319, %cst_139 [0] : vector<8x16xf32> to vector<16xf32>
    %321 = vector.shape_cast %320 : vector<16xf32> to vector<1x16xf32>
    %cst_140 = arith.constant 8.000000e+00 : f32
    %322 = vector.broadcast %cst_140 : f32 to vector<1x16xf32>
    %323 = arith.divf %321, %322 : vector<1x16xf32>
    %cst_141 = arith.constant dense<0xFF800000> : vector<16xf32>
    %324 = vector.multi_reduction <maximumf>, %319, %cst_141 [0] : vector<8x16xf32> to vector<16xf32>
    %325 = vector.shape_cast %324 : vector<16xf32> to vector<1x16xf32>
    %326 = tpu.concatenate %323, %325 in 0 : vector<1x16xf32>, vector<1x16xf32> -> vector<2x16xf32>
    %cst_142 = arith.constant 0.000000e+00 : f32
    %327 = vector.broadcast %cst_142 : f32 to vector<2x1xf32>
    %328 = tpu.concatenate %327, %326, %327 in 1 : vector<2x1xf32>, vector<2x16xf32>, vector<2x1xf32> -> vector<2x18xf32>
    %329 = vector.extract_strided_slice %328 {offsets = [0, 0], sizes = [2, 16], strides = [1, 1]} : vector<2x18xf32> to vector<2x16xf32>
    %330 = vector.extract_strided_slice %328 {offsets = [0, 1], sizes = [2, 16], strides = [1, 1]} : vector<2x18xf32> to vector<2x16xf32>
    %331 = vector.extract_strided_slice %328 {offsets = [0, 2], sizes = [2, 16], strides = [1, 1]} : vector<2x18xf32> to vector<2x16xf32>
    %cst_143 = arith.constant 1.000000e+00 : f32
    %332 = vector.broadcast %cst_143 : f32 to vector<1x16xf32>
    %333 = tpu.concatenate %329, %330, %331, %332 in 0 : vector<2x16xf32>, vector<2x16xf32>, vector<2x16xf32>, vector<1x16xf32> -> vector<7x16xf32>
    %c0_144 = arith.constant 0 : index
    %c0_145 = arith.constant 0 : index
    %334 = vector.load %arg19[%c0_144, %c0_145] : memref<1x7xf32, #tpu.memory_space<vmem>>, vector<1x7xf32>
    %cst_146 = arith.constant dense<0.000000e+00> : vector<1x16xf32>
    %335 = tpu.matmul %334, %333, %cst_146 {dimension_numbers = #tpu.dot_dimension_numbers<[1], [0], [0], [1], [0, 0, 1, 1], [], []>} : vector<1x7xf32>, vector<7x16xf32>, vector<1x16xf32> -> vector<1x16xf32>
    %cst_147 = arith.constant 0.000000e+00 : f32
    %336 = vector.broadcast %cst_147 : f32 to vector<1x16xf32>
    %337 = arith.subf %336, %335 : vector<1x16xf32>
    %338 = math.exp %337 : vector<1x16xf32>
    %cst_148 = arith.constant 1.000000e+00 : f32
    %339 = vector.broadcast %cst_148 : f32 to vector<1x16xf32>
    %340 = arith.addf %339, %338 : vector<1x16xf32>
    %341 = tpu.reciprocal %340 {approx = true} : vector<1x16xf32> -> vector<1x16xf32>
    %342 = vector.broadcast %341 : vector<1x16xf32> to vector<8x16xf32>
    %343 = arith.mulf %319, %342 : vector<8x16xf32>
    %344 = arith.addf %208, %343 : vector<8x16xf32>
    %cst_149 = arith.constant dense<0.000000e+00> : vector<8xf32>
    %345 = vector.multi_reduction <add>, %344, %cst_149 [1] : vector<8x16xf32> to vector<8xf32>
    %346 = vector.shape_cast %345 : vector<8xf32> to vector<8x1xf32>
    %cst_150 = arith.constant 1.600000e+01 : f32
    %347 = vector.broadcast %cst_150 : f32 to vector<8x1xf32>
    %348 = arith.divf %346, %347 : vector<8x1xf32>
    %cst_151 = arith.constant dense<0xFF800000> : vector<8xf32>
    %349 = vector.multi_reduction <maximumf>, %344, %cst_151 [1] : vector<8x16xf32> to vector<8xf32>
    %350 = vector.shape_cast %349 : vector<8xf32> to vector<8x1xf32>
    %351 = tpu.concatenate %348, %350 in 1 : vector<8x1xf32>, vector<8x1xf32> -> vector<8x2xf32>
    %cst_152 = arith.constant 1.000000e+00 : f32
    %352 = vector.broadcast %cst_152 : f32 to vector<1x2xf32>
    %353 = tpu.concatenate %351, %352 in 0 : vector<8x2xf32>, vector<1x2xf32> -> vector<9x2xf32>
    %c0_153 = arith.constant 0 : index
    %c0_154 = arith.constant 0 : index
    %354 = vector.load %arg20[%c0_153, %c0_154] : memref<4x9xf32, #tpu.memory_space<vmem>>, vector<4x9xf32>
    %cst_155 = arith.constant dense<0.000000e+00> : vector<4x2xf32>
    %355 = tpu.matmul %354, %353, %cst_155 {dimension_numbers = #tpu.dot_dimension_numbers<[1], [0], [0], [1], [0, 0, 1, 1], [], []>} : vector<4x9xf32>, vector<9x2xf32>, vector<4x2xf32> -> vector<4x2xf32>
    %cst_156 = arith.constant 0.000000e+00 : f32
    %356 = vector.broadcast %cst_156 : f32 to vector<4x2xf32>
    %357 = arith.maximumf %355, %356 : vector<4x2xf32>
    %cst_157 = arith.constant 1.000000e+00 : f32
    %358 = vector.broadcast %cst_157 : f32 to vector<1x2xf32>
    %359 = tpu.concatenate %357, %358 in 0 : vector<4x2xf32>, vector<1x2xf32> -> vector<5x2xf32>
    %c0_158 = arith.constant 0 : index
    %c0_159 = arith.constant 0 : index
    %360 = vector.load %arg21[%c0_158, %c0_159] : memref<8x5xf32, #tpu.memory_space<vmem>>, vector<8x5xf32>
    %cst_160 = arith.constant dense<0.000000e+00> : vector<8x2xf32>
    %361 = tpu.matmul %360, %359, %cst_160 {dimension_numbers = #tpu.dot_dimension_numbers<[1], [0], [0], [1], [0, 0, 1, 1], [], []>} : vector<8x5xf32>, vector<5x2xf32>, vector<8x2xf32> -> vector<8x2xf32>
    %362 = vector.extract_strided_slice %361 {offsets = [0, 0], sizes = [8, 1], strides = [1, 1]} : vector<8x2xf32> to vector<8x1xf32>
    %363 = vector.extract_strided_slice %361 {offsets = [0, 1], sizes = [8, 1], strides = [1, 1]} : vector<8x2xf32> to vector<8x1xf32>
    %364 = arith.addf %362, %363 : vector<8x1xf32>
    %cst_161 = arith.constant 0.000000e+00 : f32
    %365 = vector.broadcast %cst_161 : f32 to vector<8x1xf32>
    %366 = arith.subf %365, %364 : vector<8x1xf32>
    %367 = math.exp %366 : vector<8x1xf32>
    %cst_162 = arith.constant 1.000000e+00 : f32
    %368 = vector.broadcast %cst_162 : f32 to vector<8x1xf32>
    %369 = arith.addf %368, %367 : vector<8x1xf32>
    %370 = tpu.reciprocal %369 {approx = true} : vector<8x1xf32> -> vector<8x1xf32>
    %371 = vector.broadcast %370 : vector<8x1xf32> to vector<8x16xf32>
    %372 = arith.mulf %344, %371 : vector<8x16xf32>
    %373 = arith.addf %372, %188 : vector<8x16xf32>
    %cst_163 = arith.constant 0.000000e+00 : f32
    %374 = vector.broadcast %cst_163 : f32 to vector<8x1xf32>
    %375 = tpu.concatenate %374, %373, %374 in 1 : vector<8x1xf32>, vector<8x16xf32>, vector<8x1xf32> -> vector<8x18xf32>
    %376 = vector.extract_strided_slice %375 {offsets = [0, 0], sizes = [8, 16], strides = [1, 1]} : vector<8x18xf32> to vector<8x16xf32>
    %377 = vector.extract_strided_slice %375 {offsets = [0, 1], sizes = [8, 16], strides = [1, 1]} : vector<8x18xf32> to vector<8x16xf32>
    %378 = vector.extract_strided_slice %375 {offsets = [0, 2], sizes = [8, 16], strides = [1, 1]} : vector<8x18xf32> to vector<8x16xf32>
    %cst_164 = arith.constant 1.000000e+00 : f32
    %379 = vector.broadcast %cst_164 : f32 to vector<1x16xf32>
    %380 = tpu.concatenate %376, %377, %378, %379 in 0 : vector<8x16xf32>, vector<8x16xf32>, vector<8x16xf32>, vector<1x16xf32> -> vector<25x16xf32>
    %c0_165 = arith.constant 0 : index
    %c0_166 = arith.constant 0 : index
    %381 = vector.load %arg22[%c0_165, %c0_166] : memref<1x25xf32, #tpu.memory_space<vmem>>, vector<1x25xf32>
    %cst_167 = arith.constant dense<0.000000e+00> : vector<1x16xf32>
    %382 = tpu.matmul %381, %380, %cst_167 {dimension_numbers = #tpu.dot_dimension_numbers<[1], [0], [0], [1], [0, 0, 1, 1], [], []>} : vector<1x25xf32>, vector<25x16xf32>, vector<1x16xf32> -> vector<1x16xf32>
    %cst_168 = arith.constant 1.000000e+00 : f32
    %383 = vector.broadcast %cst_168 : f32 to vector<1x1xf32>
    %384 = tpu.concatenate %382, %383 in 1 : vector<1x16xf32>, vector<1x1xf32> -> vector<1x17xf32>
    %c0_169 = arith.constant 0 : index
    %c0_170 = arith.constant 0 : index
    %385 = vector.load %arg23[%c0_169, %c0_170] : memref<17x4xf32, #tpu.memory_space<vmem>>, vector<17x4xf32>
    %cst_171 = arith.constant dense<0.000000e+00> : vector<1x4xf32>
    %386 = tpu.matmul %384, %385, %cst_171 {dimension_numbers = #tpu.dot_dimension_numbers<[1], [0], [0], [1], [0, 0, 1, 1], [], []>} : vector<1x17xf32>, vector<17x4xf32>, vector<1x4xf32> -> vector<1x4xf32>
    %cst_172 = arith.constant 0.000000e+00 : f32
    %387 = vector.broadcast %cst_172 : f32 to vector<1x4xf32>
    %388 = arith.maximumf %386, %387 : vector<1x4xf32>
    %389 = math.absf %386 : vector<1x4xf32>
    %cst_173 = arith.constant 0.000000e+00 : f32
    %390 = vector.broadcast %cst_173 : f32 to vector<1x4xf32>
    %391 = arith.subf %390, %389 : vector<1x4xf32>
    %392 = math.exp %391 : vector<1x4xf32>
    %cst_174 = arith.constant 1.000000e+00 : f32
    %393 = vector.broadcast %cst_174 : f32 to vector<1x4xf32>
    %394 = arith.addf %393, %392 : vector<1x4xf32>
    %395 = math.log %394 : vector<1x4xf32>
    %396 = arith.addf %388, %395 : vector<1x4xf32>
    %397 = tpu.iota {dimensions = array<i32: 1>} : vector<1x4xi32>
    %c0_i32 = arith.constant 0 : i32
    %398 = vector.broadcast %c0_i32 : i32 to vector<1x4xi32>
    %399 = arith.cmpi eq, %397, %398 : vector<1x4xi32>
    %400 = arith.select %399, %386, %396 : vector<1x4xi1>, vector<1x4xf32>
    %c2_i32 = arith.constant 2 : i32
    %401 = vector.broadcast %c2_i32 : i32 to vector<1x4xi32>
    %402 = arith.cmpi eq, %397, %401 : vector<1x4xi32>
    %cst_175 = arith.constant 1.000000e+00 : f32
    %cst_176 = arith.constant 0.000000e+00 : f32
    %403 = vector.broadcast %cst_175 : f32 to vector<1x4xf32>
    %404 = vector.broadcast %cst_176 : f32 to vector<1x4xf32>
    %405 = arith.select %402, %403, %404 : vector<1x4xi1>, vector<1x4xf32>
    %406 = arith.addf %400, %405 : vector<1x4xf32>
    %c0_177 = arith.constant 0 : index
    %c0_178 = arith.constant 0 : index
    %c0_179 = arith.constant 0 : index
    %407 = vector.load %arg24[%c0_177, %c0_178, %c0_179] : memref<1x1x4xf32, #tpu.memory_space<vmem>>, vector<1x1x4xf32>
    %408 = vector.shape_cast %407 : vector<1x1x4xf32> to vector<1x4xf32>
    %409 = vector.shape_cast %406 : vector<1x4xf32> to vector<1x1x4xf32>
    tpu.vector_store %arg24[%c0_177, %c0_178, %c0_179], %409 {strides = array<i32>} : memref<1x1x4xf32, #tpu.memory_space<vmem>>, vector<1x1x4xf32>,
    return
  }
  func.func @transform_0(%arg0: i32) -> (i32, i32, i32) {
    %c0_i32 = arith.constant 0 : i32
    %c0_i32_0 = arith.constant 0 : i32
    %c0_i32_1 = arith.constant 0 : i32
    return %arg0, %c0_i32, %c0_i32_0 : i32, i32, i32
  }
  func.func @transform_1(%arg0: i32) -> (i32, i32) {
    %c0_i32 = arith.constant 0 : i32
    %c0_i32_0 = arith.constant 0 : i32
    %c0_i32_1 = arith.constant 0 : i32
    return %c0_i32, %c0_i32_0 : i32, i32
  }
  func.func @transform_2(%arg0: i32) -> (i32, i32) {
    %c0_i32 = arith.constant 0 : i32
    %c0_i32_0 = arith.constant 0 : i32
    %c0_i32_1 = arith.constant 0 : i32
    return %c0_i32, %c0_i32_0 : i32, i32
  }
  func.func @transform_3(%arg0: i32) -> (i32, i32) {
    %c0_i32 = arith.constant 0 : i32
    %c0_i32_0 = arith.constant 0 : i32
    %c0_i32_1 = arith.constant 0 : i32
    return %c0_i32, %c0_i32_0 : i32, i32
  }
  func.func @transform_4(%arg0: i32) -> (i32, i32) {
    %c0_i32 = arith.constant 0 : i32
    %c0_i32_0 = arith.constant 0 : i32
    %c0_i32_1 = arith.constant 0 : i32
    return %c0_i32, %c0_i32_0 : i32, i32
  }
  func.func @transform_5(%arg0: i32) -> (i32, i32) {
    %c0_i32 = arith.constant 0 : i32
    %c0_i32_0 = arith.constant 0 : i32
    %c0_i32_1 = arith.constant 0 : i32
    return %c0_i32, %c0_i32_0 : i32, i32
  }
  func.func @transform_6(%arg0: i32) -> (i32, i32) {
    %c0_i32 = arith.constant 0 : i32
    %c0_i32_0 = arith.constant 0 : i32
    %c0_i32_1 = arith.constant 0 : i32
    return %c0_i32, %c0_i32_0 : i32, i32
  }
  func.func @transform_7(%arg0: i32) -> (i32, i32) {
    %c0_i32 = arith.constant 0 : i32
    %c0_i32_0 = arith.constant 0 : i32
    %c0_i32_1 = arith.constant 0 : i32
    return %c0_i32, %c0_i32_0 : i32, i32
  }
  func.func @transform_8(%arg0: i32) -> (i32, i32) {
    %c0_i32 = arith.constant 0 : i32
    %c0_i32_0 = arith.constant 0 : i32
    %c0_i32_1 = arith.constant 0 : i32
    return %c0_i32, %c0_i32_0 : i32, i32
  }
  func.func @transform_9(%arg0: i32) -> (i32, i32) {
    %c0_i32 = arith.constant 0 : i32
    %c0_i32_0 = arith.constant 0 : i32
    %c0_i32_1 = arith.constant 0 : i32
    return %c0_i32, %c0_i32_0 : i32, i32
  }
  func.func @transform_10(%arg0: i32) -> (i32, i32) {
    %c0_i32 = arith.constant 0 : i32
    %c0_i32_0 = arith.constant 0 : i32
    %c0_i32_1 = arith.constant 0 : i32
    return %c0_i32, %c0_i32_0 : i32, i32
  }
  func.func @transform_11(%arg0: i32) -> (i32, i32) {
    %c0_i32 = arith.constant 0 : i32
    %c0_i32_0 = arith.constant 0 : i32
    %c0_i32_1 = arith.constant 0 : i32
    return %c0_i32, %c0_i32_0 : i32, i32
  }
  func.func @transform_12(%arg0: i32) -> (i32, i32) {
    %c0_i32 = arith.constant 0 : i32
    %c0_i32_0 = arith.constant 0 : i32
    %c0_i32_1 = arith.constant 0 : i32
    return %c0_i32, %c0_i32_0 : i32, i32
  }
  func.func @transform_13(%arg0: i32) -> (i32, i32) {
    %c0_i32 = arith.constant 0 : i32
    %c0_i32_0 = arith.constant 0 : i32
    %c0_i32_1 = arith.constant 0 : i32
    return %c0_i32, %c0_i32_0 : i32, i32
  }
  func.func @transform_14(%arg0: i32) -> (i32, i32) {
    %c0_i32 = arith.constant 0 : i32
    %c0_i32_0 = arith.constant 0 : i32
    %c0_i32_1 = arith.constant 0 : i32
    return %c0_i32, %c0_i32_0 : i32, i32
  }
  func.func @transform_15(%arg0: i32) -> (i32, i32) {
    %c0_i32 = arith.constant 0 : i32
    %c0_i32_0 = arith.constant 0 : i32
    %c0_i32_1 = arith.constant 0 : i32
    return %c0_i32, %c0_i32_0 : i32, i32
  }
  func.func @transform_16(%arg0: i32) -> (i32, i32) {
    %c0_i32 = arith.constant 0 : i32
    %c0_i32_0 = arith.constant 0 : i32
    %c0_i32_1 = arith.constant 0 : i32
    return %c0_i32, %c0_i32_0 : i32, i32
  }
  func.func @transform_17(%arg0: i32) -> (i32, i32) {
    %c0_i32 = arith.constant 0 : i32
    %c0_i32_0 = arith.constant 0 : i32
    %c0_i32_1 = arith.constant 0 : i32
    return %c0_i32, %c0_i32_0 : i32, i32
  }
  func.func @transform_18(%arg0: i32) -> (i32, i32) {
    %c0_i32 = arith.constant 0 : i32
    %c0_i32_0 = arith.constant 0 : i32
    %c0_i32_1 = arith.constant 0 : i32
    return %c0_i32, %c0_i32_0 : i32, i32
  }
  func.func @transform_19(%arg0: i32) -> (i32, i32) {
    %c0_i32 = arith.constant 0 : i32
    %c0_i32_0 = arith.constant 0 : i32
    %c0_i32_1 = arith.constant 0 : i32
    return %c0_i32, %c0_i32_0 : i32, i32
  }
  func.func @transform_20(%arg0: i32) -> (i32, i32) {
    %c0_i32 = arith.constant 0 : i32
    %c0_i32_0 = arith.constant 0 : i32
    %c0_i32_1 = arith.constant 0 : i32
    return %c0_i32, %c0_i32_0 : i32, i32
  }
  func.func @transform_21(%arg0: i32) -> (i32, i32) {
    %c0_i32 = arith.constant 0 : i32
    %c0_i32_0 = arith.constant 0 : i32
    %c0_i32_1 = arith.constant 0 : i32
    return %c0_i32, %c0_i32_0 : i32, i32
  }
  func.func @transform_22(%arg0: i32) -> (i32, i32) {
    %c0_i32 = arith.constant 0 : i32
    %c0_i32_0 = arith.constant 0 : i32
    %c0_i32_1 = arith.constant 0 : i32
    return %c0_i32, %c0_i32_0 : i32, i32
  }
  func.func @transform_23(%arg0: i32) -> (i32, i32, i32) {
    %c0_i32 = arith.constant 0 : i32
    %c0_i32_0 = arith.constant 0 : i32
    %c0_i32_1 = arith.constant 0 : i32
    return %arg0, %c0_i32, %c0_i32_0 : i32, i32, i32
  }
}

</mosaic_0001>

<bundles_post_ra>
// kernel: usffnet_forward.1
= control target key start
LH: loop header
LB: loop body
LE: loop exit
PB: predicated region body
PF: predicated region fallthrough
CT: control target
= control target key end

     0   :  { %s5953_s0 = inlined_call_operand.vmem [shape: f32[2,8,16], index: 0, kind: input, shape index: {}]   ;;  %s5954_s1 = inlined_call_operand.vmem [shape: f32[16,16], index: 1, kind: input, shape index: {}]   ;;  %s5955_s2 = inlined_call_operand.vmem [shape: f32[16,16], index: 2, kind: input, shape index: {}]   ;;  %s5956_s3 = inlined_call_operand.vmem [shape: f32[8,25], index: 3, kind: input, shape index: {}]   ;;  %s5957_s4 = inlined_call_operand.vmem [shape: f32[8,25], index: 4, kind: input, shape index: {}]   ;;  %s5958_s5 = inlined_call_operand.vmem [shape: f32[8,25], index: 5, kind: input, shape index: {}]   ;;  %s5959_s6 = inlined_call_operand.vmem [shape: f32[8,25], index: 6, kind: input, shape index: {}]   ;;  %s5960_s7 = inlined_call_operand.vmem [shape: f32[8,25], index: 7, kind: input, shape index: {}]   ;;  %s5961_s8 = inlined_call_operand.vmem [shape: f32[8,25], index: 8, kind: input, shape index: {}]   ;;  %s5962_s9 = inlined_call_operand.hbm [shape: f32[1,7], index: 9, kind: input, shape index: {}]   ;;  %s5963_s10 = inlined_call_operand.hbm [shape: f32[4,9], index: 10, kind: input, shape index: {}]   ;;  %s5964_s11 = inlined_call_operand.vmem [shape: f32[8,5], index: 11, kind: input, shape index: {}]   ;;  %s5965_s12 = inlined_call_operand.vmem [shape: f32[8,25], index: 12, kind: input, shape index: {}]   ;;  %s5966_s13 = inlined_call_operand.hbm [shape: f32[8,25], index: 13, kind: input, shape index: {}]   ;;  %s5967_s14 = inlined_call_operand.hbm [shape: f32[8,25], index: 14, kind: input, shape index: {}]   ;;  %s5968_s15 = inlined_call_operand.hbm [shape: f32[8,25], index: 15, kind: input, shape index: {}]   ;;  %s5969_s16 = inlined_call_operand.vmem [shape: f32[8,25], index: 16, kind: input, shape index: {}]   ;;  %s5970_s17 = inlined_call_operand.hbm [shape: f32[8,25], index: 17, kind: input, shape index: {}]   ;;  %s5971_s18 = inlined_call_operand.hbm [shape: f32[1,7], index: 18, kind: input, shape index: {}]   ;;  %s5972_s19 = inlined_call_operand.hbm [shape: f32[4,9], index: 19, kind: input, shape index: {}]   ;;  %s5973_s20 = inlined_call_operand.vmem [shape: f32[8,5], index: 20, kind: input, shape index: {}]   ;;  %s5974_s21 = inlined_call_operand.hbm [shape: f32[1,25], index: 21, kind: input, shape index: {}]   ;;  %s5975_s22 = inlined_call_operand.vmem [shape: f32[17,4], index: 22, kind: input, shape index: {}]   ;;  %s5976_s23 = inlined_call_operand.vmem [shape: f32[2,1,4], index: 23, kind: output, shape index: {}]  }
   0x1   :  { %5987 = sst [smem:[#allocation21_spill]] %s5953_s0 }
   0x2   :  { %5988 = sst [smem:[#allocation22_spill]] %s5954_s1 }
   0x3   :  { %5989 = sst [smem:[#allocation23_spill]] %s5955_s2 }
   0x4   :  { %5990 = sst [smem:[#allocation24_spill]] %s5956_s3 }
   0x5   :  { %5991 = sst [smem:[#allocation25_spill]] %s5957_s4 }
   0x6   :  { %5992 = sst [smem:[#allocation26_spill]] %s5958_s5 }
   0x7   :  { %5993 = sst [smem:[#allocation27_spill]] %s5959_s6 }
   0x8   :  { %5994 = sst [smem:[#allocation28_spill]] %s5960_s7 }
   0x9   :  { %28 = vsyncpa [#allocation3], 0 }
   0xa   :  { %29 = vsyncpa [#allocation5], 0 }
   0xb   :  { %30 = vsyncpa [#allocation8], 0 }
   0xc   :  { %31 = vsyncpa [#allocation11], 0 }
   0xd   :  { %32 = vsyncpa [#allocation14], 0  ;;  %s5276_s4 = smov 0  }
   0xe LB: > { %s5134_s30 = smov [#allocation4]   ;;  %s5282_s25 = sadd.s32 4294967295, %s5132_s4   ;;  %s5132_s4 = sphi %s5276_s4, %s38_s4  }
   0xf   : > { %s605_s24 = sshll.u32 %s5134_s30, 4  ;;  %p4202_p0 = scmp.ge.s32.totalorder %s5132_s4, 1  ;;  %s606_s24 = int_to_ptr.vmem [resolvable:$true] %s605_s24 }
  0x10   : > { %p557_p1 = scmp.lt.s32.totalorder %s5132_s4, 3  ;;  %p5979_p2 = scmp.eq.s32.totalorder %s5282_s25, 0 }
  0x11   : > { %s5135_s1 = smov [#allocation7]   ;;  %s5136_s2 = smov [#allocation10]  }
  0x12   : > { %p5287_p3 = pnand %p4202_p0, %p557_p1  ;;  %s633_s26 = sshll.u32 %s5135_s1, 4  ;;  %s634_s26 = int_to_ptr.vmem [resolvable:$true] %s633_s26 }
  0x13   : > { %s658_s6 = sshll.u32 %s5136_s2, 4  ;;  %s5137_s7 = smov [#allocation13]   ;;  %s5299_s6 = int_to_ptr.vmem [resolvable:$true] %s658_s6 }
  0x14   : > { %s5995_s5 = scalar_select %p5287_p3, 1, 0 }
  0x15   : > { %p4746_p4 = pneg %p5287_p3  ;;  %s680_s28 = sshll.u32 %s5137_s7, 4  ;;  %s5301_s28 = int_to_ptr.vmem [resolvable:$true] %s680_s28 }
  0x16   : > { %s4883_s3 = scalar_lea.vmem %s606_s24, 64  ;;  %p4891_p10 = scmp.lt.s32.totalorder %s606_s24, %s606_s24 }
  0x17   : > { %p5295_p5 = pnand %p5979_p2, %p4746_p4  ;;  %p4884_p7 = scmp.ne.s32.totalorder %s606_s24, %s4883_s3 }
  0x18   : > { %p4892_p11 = scmp.lt.s32.totalorder %s4883_s3, %s4883_s3 }
  0x19   : > { %p5305_p6 = pneg %p5295_p5 }
  0x1a   : > { %p4893_p12 = por %p4892_p11, %p4891_p10 }
  0x1b   : > { %p4886_p8 = pnand %p4884_p7, %p5305_p6 }
  0x1d   : > { %p4887_p9 = pneg %p4886_p8 }
  0x1f   : > { %p4894_p13 = pnand %p4893_p12, %p4887_p9 }
  0x21   : > { %4897 = shalt.err (!%p4894_p13)
}
  0x22   : > { %4752 = dma.hbm_to_vmem [thread:$0]  (!%p5295_p5), %s5963_s10, 64, %s606_s24, [#allocation5]  }
  0x23   : > { %s4909_s1 = scalar_lea.vmem %s634_s26, 128  ;;  %p4917_p2 = scmp.lt.s32.totalorder %s634_s26, %s634_s26 }
  0x24   : > { %p4910_p0 = scmp.ne.s32.totalorder %s634_s26, %s4909_s1  ;;  %p4918_p7 = scmp.lt.s32.totalorder %s4909_s1, %s4909_s1 }
  0x26   : > { %p4912_p1 = pnand %p4910_p0, %p5305_p6  ;;  %p4919_p8 = por %p4918_p7, %p4917_p2 }
  0x28   : > { %p4913_p4 = pneg %p4912_p1 }
  0x2a   : > { %p4920_p3 = pnand %p4919_p8, %p4913_p4 }
  0x2c   : > { %4923 = shalt.err (!%p4920_p3)
}
  0x2d   : > { %4758 = dma.hbm_to_vmem [thread:$0]  (!%p5295_p5), %s5967_s14, 128, %s634_s26, [#allocation8]  }
  0x2e   : > { %s4935_s24 = scalar_lea.vmem %s5299_s6, 128  ;;  %p4943_p12 = scmp.lt.s32.totalorder %s5299_s6, %s5299_s6 }
  0x2f   : > { %p4936_p9 = scmp.ne.s32.totalorder %s5299_s6, %s4935_s24  ;;  %p4944_p2 = scmp.lt.s32.totalorder %s4935_s24, %s4935_s24 }
  0x31   : > { %p4938_p10 = pnand %p4936_p9, %p5305_p6  ;;  %p4945_p13 = por %p4944_p2, %p4943_p12 }
  0x33   : > { %p4939_p11 = pneg %p4938_p10 }
  0x35   : > { %p4946_p3 = pnand %p4945_p13, %p4939_p11 }
  0x37   : > { %4949 = shalt.err (!%p4946_p3)
}
  0x38   : > { %4764 = dma.hbm_to_vmem [thread:$0]  (!%p5295_p5), %s5970_s17, 128, %s5299_s6, [#allocation11]  }
  0x39   : > { %s4961_s26 = scalar_lea.vmem %s5301_s28, 64  ;;  %p4969_p7 = scmp.lt.s32.totalorder %s5301_s28, %s5301_s28 }
  0x3a   : > { %p4962_p0 = scmp.ne.s32.totalorder %s5301_s28, %s4961_s26  ;;  %p4970_p8 = scmp.lt.s32.totalorder %s4961_s26, %s4961_s26 }
  0x3c   : > { %p4964_p1 = pnand %p4962_p0, %p5305_p6  ;;  %p4971_p9 = por %p4970_p8, %p4969_p7 }
  0x3e   : > { %p4965_p4 = pneg %p4964_p1 }
  0x40   : > { %p4972_p10 = pnand %p4971_p9, %p4965_p4 }
  0x42   : > { %4975 = shalt.err (!%p4972_p10)
}
  0x43   : > { %4770 = dma.hbm_to_vmem [thread:$0]  (!%p5295_p5), %s5972_s19, 64, %s5301_s28, [#allocation14]  }
  0x44   : > { %s5138_s6 = smov [#allocation2]   ;;  %s5139_s7 = smov [#allocation6]  }
  0x45   : > { %s594_s2 = sshll.u32 %s5138_s6, 4  ;;  %s622_s24 = sshll.u32 %s5139_s7, 4  ;;  %s595_s2 = int_to_ptr.vmem [resolvable:$true] %s594_s2  ;;  %s623_s24 = int_to_ptr.vmem [resolvable:$true] %s622_s24 }
  0x46   : > { %s4987_s3 = scalar_lea.vmem %s595_s2, 16  ;;  %s4994_s0 = scalar_lea.vmem %s595_s2, 32 }
  0x47   : > { %p4988_p11 = scmp.ne.s32.totalorder %s595_s2, %s4987_s3  ;;  %p4995_p13 = scmp.lt.s32.totalorder %s595_s2, %s595_s2 }
  0x48   : > { %p4996_p3 = scmp.lt.s32.totalorder %s4994_s0, %s4987_s3 }
  0x49   : > { %p4990_p12 = pnand %p4988_p11, %p5305_p6 }
  0x4a   : > { %p4997_p0 = por %p4996_p3, %p4995_p13 }
  0x4b   : > { %p4991_p2 = pneg %p4990_p12 }
  0x4d   : > { %p4998_p1 = pnand %p4997_p0, %p4991_p2 }
  0x4f   : > { %5001 = shalt.err (!%p4998_p1)
}
  0x50   : > { %4749 = dma.hbm_to_vmem [thread:$0]  (!%p5295_p5), %s5962_s9, 16, %s595_s2, [#allocation3]  }
  0x51   : > { %s5013_s30 = scalar_lea.vmem %s623_s24, 128  ;;  %p5021_p9 = scmp.lt.s32.totalorder %s623_s24, %s623_s24 }
  0x52   : > { %p5014_p4 = scmp.ne.s32.totalorder %s623_s24, %s5013_s30  ;;  %p5022_p10 = scmp.lt.s32.totalorder %s5013_s30, %s5013_s30 }
  0x54   : > { %p5016_p7 = pnand %p5014_p4, %p5305_p6  ;;  %p5023_p11 = por %p5022_p10, %p5021_p9 }
  0x56   : > { %p5017_p8 = pneg %p5016_p7 }
  0x58   : > { %p5024_p12 = pnand %p5023_p11, %p5017_p8 }
  0x5a   : > { %5027 = shalt.err (!%p5024_p12)
}
  0x5b   : > { %4755 = dma.hbm_to_vmem [thread:$0]  (!%p5295_p5), %s5966_s13, 128, %s623_s24, [#allocation5]  }
  0x5c   : > { %s5140_s7 = smov [#allocation9]   ;;  %s5141_s3 = smov [#allocation12]  }
  0x5d   : > { %s644_s2 = sshll.u32 %s5140_s7, 4  ;;  %s669_s0 = sshll.u32 %s5141_s3, 4  ;;  %s645_s2 = int_to_ptr.vmem [resolvable:$true] %s644_s2  ;;  %s670_s0 = int_to_ptr.vmem [resolvable:$true] %s669_s0 }
  0x5e   : > { %s5039_s26 = scalar_lea.vmem %s645_s2, 128  ;;  %p5047_p0 = scmp.lt.s32.totalorder %s645_s2, %s645_s2 }
  0x5f   : > { %p5040_p2 = scmp.ne.s32.totalorder %s645_s2, %s5039_s26  ;;  %p5048_p1 = scmp.lt.s32.totalorder %s5039_s26, %s5039_s26 }
  0x61   : > { %p5042_p13 = pnand %p5040_p2, %p5305_p6  ;;  %p5049_p4 = por %p5048_p1, %p5047_p0 }
  0x63   : > { %p5043_p3 = pneg %p5042_p13 }
  0x65   : > { %p5050_p7 = pnand %p5049_p4, %p5043_p3 }
  0x67   : > { %5053 = shalt.err (!%p5050_p7)
}
  0x68   : > { %4761 = dma.hbm_to_vmem [thread:$0]  (!%p5295_p5), %s5968_s15, 128, %s645_s2, [#allocation8]  }
  0x69   : > { %s5065_s24 = scalar_lea.vmem %s670_s0, 16  ;;  %s5072_s1 = scalar_lea.vmem %s670_s0, 32 }
  0x6a   : > { %p5066_p8 = scmp.ne.s32.totalorder %s670_s0, %s5065_s24  ;;  %p5073_p11 = scmp.lt.s32.totalorder %s670_s0, %s670_s0 }
  0x6b   : > { %p5074_p12 = scmp.lt.s32.totalorder %s5072_s1, %s5065_s24 }
  0x6c   : > { %p5068_p9 = pnand %p5066_p8, %p5305_p6 }
  0x6d   : > { %p5075_p2 = por %p5074_p12, %p5073_p11 }
  0x6e   : > { %p5069_p10 = pneg %p5068_p9 }
  0x70   : > { %p5076_p13 = pnand %p5075_p2, %p5069_p10 }
  0x72   : > { %5079 = shalt.err (!%p5076_p13)
}
  0x73   : > { %4767 = dma.hbm_to_vmem [thread:$0]  (!%p5295_p5), %s5971_s18, 16, %s670_s0, [#allocation11]  }
  0x74   : > { %s5142_s2 = smov [#allocation15]  }
  0x75   : > { %s694_s3 = sshll.u32 %s5142_s2, 4  ;;  %s695_s3 = int_to_ptr.vmem [resolvable:$true] %s694_s3 }
  0x76   : > { %s5091_s26 = scalar_lea.vmem %s695_s3, 16  ;;  %s5098_s28 = scalar_lea.vmem %s695_s3, 32 }
  0x77   : > { %p5092_p3 = scmp.ne.s32.totalorder %s695_s3, %s5091_s26  ;;  %p5099_p4 = scmp.lt.s32.totalorder %s695_s3, %s695_s3 }
  0x78   : > { %p5100_p7 = scmp.lt.s32.totalorder %s5098_s28, %s5091_s26 }
  0x79   : > { %p5094_p0 = pnand %p5092_p3, %p5305_p6 }
  0x7a   : > { %p5101_p8 = por %p5100_p7, %p5099_p4 }
  0x7b   : > { %p5095_p1 = pneg %p5094_p0 }
  0x7d   : > { %p5102_p9 = pnand %p5101_p8, %p5095_p1 }
  0x7f   : > { %5105 = shalt.err (!%p5102_p9)
}
  0x80   : > { %4773 = dma.hbm_to_vmem [thread:$0]  (!%p5295_p5), %s5974_s21, 16, %s695_s3, [#allocation14]  }
  0x81   : > { %p5998_p10 = scmp.ne.s32.totalorder %s5995_s5, 0 }
  0x82   : > { %p5999_p11 = scmp.eq.s32.totalorder (!%p5998_p10), %s5282_s25, 0 }
  0x83   : > { %717 = sbr.rel (%p5998_p10) target bundleno = 7729 (0x1e31), region = 112 }
  0x88   : > { %5111 = dma.done.wait (%p5999_p11), [#allocation3], 16   ;;  %p6000_p6 = pmov %p5999_p11 }
  0x8a   : > { %5113 = vsyncadd (%p6000_p6), [#allocation3], 4294967280  ;;  %p6001_p12 = pmov %p6000_p6 }
  0x8b   : > { %p6002_p2 = pmov %p6000_p6 }
  0x8c   : > { %5115 = dma.done.wait (%p6001_p12), [#allocation5], 192  }
  0x8d   : > { %5117 = vsyncadd (%p6002_p2), [#allocation5], 4294967104  ;;  %p6003_p13 = pmov %p6002_p2 }
  0x8e   : > { %p6004_p5 = pmov %p6002_p2 }
  0x8f   : > { %5119 = dma.done.wait (%p6003_p13), [#allocation8], 256  }
  0x90   : > { %5121 = vsyncadd (%p6004_p5), [#allocation8], 4294967040  ;;  %p6005_p3 = pmov %p6002_p2 }
  0x91   : > { %p6006_p0 = pmov %p6002_p2 }
  0x92   : > { %5123 = dma.done.wait (%p6005_p3), [#allocation11], 144  }
  0x93   : > { %5125 = vsyncadd (%p6006_p0), [#allocation11], 4294967152  ;;  %p6007_p1 = pmov %p6006_p0 }
  0x94   : > { %p6008_p4 = pmov %p6006_p0 }
  0x95   : > { %5127 = dma.done.wait (%p6007_p1), [#allocation14], 80  }
  0x96   : > { %5129 = vsyncadd (%p6008_p4), [#allocation14], 4294967216  ;;  %p810_p7 = scmp.lt.s32.totalorder %s5282_s25, 1  ;;  %vm842_vm0 = vcmask 1040384   ;;  %v5143_v0 = vmov 0.0   ;;  %v5144_v1 = vmov 1.0  }
  0x97   : > { %4432 = vmatprep.subr.mxu0 %v5143_v0  ;;  %4443 = vmatprep.subr.mxu1 %v5143_v0  ;;  %s6009_s0 = sld [smem:[#allocation21_spill]]  ;;  %s5145_s6 = smov 1   ;;  %vm5146_vm1 = vmmov 0   ;;  %vm826_vm2 = vcmask 7168   ;;  %vm828_vm3 = vcmask 138240   ;;  %vm5983_vm4 = vcmask 203776  }
  0x98   : > { %s6024_s25 = smov (!%p810_p7, %s5282_s25), 1  ;;  %4433 = vmatpush3.msk.msra.mxu0 %vm842_vm0, %v5144_v1  ;;  %4444 = vmatpush3.msk.msra.mxu1 %vm842_vm0, %v5144_v1  ;;  %s5147_s7 = smov 127   ;;  %vm1004_vm5 = vcmask 130048  }
  0x99   : > { %s4223_s5 = sshll.u32 %s6024_s25, 3  ;;  %4434 = vmatprep.subr.mxu0 %v5143_v0  ;;  %4445 = vmatprep.subr.mxu1 %v5143_v0  ;;  %s5148_s2 = smov 126  }
  0x9a   : > { %4440 = vmatprep.mubr.msk.f32.mxu0 %vm5146_vm1, %v5143_v0  ;;  %4451 = vmatprep.mubr.msk.f32.mxu1 %vm5146_vm1, %v5143_v0  ;;  %s6010_s28 = sld [smem:[#allocation24_spill]] }
  0x9b   : > { %s6012_s3 = sld [smem:[#allocation25_spill]] }
  0x9c   : > { %s6013_s30 = sld [smem:[#allocation23_spill]] }
  0x9d   : > { %s813_s1 = scalar_lea.vmem %s6009_s0, %s4223_s5  ;;  %s6011_s5 = sld [smem:[#allocation22_spill]] }
  0x9e   : > { %v5420_v2 = vld [vmem:[%s813_s1] sm:$0xff]  ;;  %s6014_s1 = sld [smem:[#allocation26_spill]] }
  0x9f   : > { %823 = vrot.lane.b32.xlu0 %v5420_v2, %s5145_s6  ;;  %s6016_s29 = sld [smem:[#allocation27_spill]] }
  0xa0   : > { %v837_v8 = vld [vmem:[%s6010_s28] sm:$0xff]  ;;  %s6015_s28 = sld [smem:[#allocation28_spill]] }
  0xa1   : > { %v930_v19 = vld [vmem:[%s6012_s3] sm:$0xff] }
  0xa2   : > { %v5476_v20 = vld [vmem:[%s6013_s30 + $0x8] sm:$0xff]  ;;  %v5484_v21 = vld [vmem:[%s6013_s30] sm:$0xff] }
  0xa3   : > { %v5446_v12 = vld [vmem:[%s6011_s5 + $0x8] sm:$0xff]  ;;  %v5453_v13 = vld [vmem:[%s6011_s5] sm:$0xff] }
 0x111   : > { %v824_v3 = vpop.permute.xlu0 %823 }
 0x112   : > { %v827_v4 = vsel %vm826_vm2, 0.0, %v824_v3 }
 0x113   : > { %v829_v5 = vsel %vm828_vm3, %v827_v4, 0.0 }
 0x114   : > { %831 = vrot.lane.b32.xlu1 %v829_v5, %s5147_s7  ;;  %834 = vrot.lane.b32.xlu0 %v829_v5, %s5148_s2 }
 0x186   : > { %v835_v6 = vpop.permute.xlu0 %834  ;;  %v832_v7 = vpop.permute.xlu1 %831 }
 0x187   : > { %4435 = vmatpush3.msra.mxu0 %v835_v6 }
 0x188   : > { %4436 = vmatprep.subr.mxu0 %v5143_v0 }
 0x189   : > { %4437 = vmatpush3.msra.mxu0 %v832_v7 }
 0x18a   : > { %4438 = vmatprep.subr.mxu0 %v5143_v0 }
 0x18b   : > { %4439 = vmatpush3.msk.msra.mxu0 %vm828_vm3, %v827_v4 }
 0x18c   : > { %4441 = vmatmul.mubr.msk.f32.vlgmr.msra.gmra.mxu0 %vm5983_vm4, %v837_v8  ;;  %4454 = vmatprep.subr.mxu0 %v5143_v0 }
 0x18d   : > { %4458 = vmatprep.mubr.msk.f32.mxu0 %vm5146_vm1, %v5143_v0  ;;  %4455 = vmatpush3.msra.mxu0 %v5446_v12 }
 0x18e   : > { %4456 = vmatprep.subr.mxu0 %v5143_v0 }
 0x18f   : > { %4457 = vmatpush3.msra.mxu0 %v5453_v13 }
 0x190   : > { %4459 = vmatmul.mubr.msk.f32.vlgmr.msra.gmra.mxu0 %vm1004_vm5, %v5420_v2  ;;  %4468 = vmatprep.subr.mxu0 %v5143_v0 }
 0x191   : > { %4469 = vmatpush3.msk.msra.mxu0 %vm842_vm0, %v5144_v1  ;;  %4476 = vmatprep.mubr.msk.f32.mxu0 %vm5146_vm1, %v5143_v0 }
 0x192   : > { %4470 = vmatprep.subr.mxu0 %v5143_v0 }
 0x24c   : > { %v912_v9 = vpop.f32.mrf.mxu0 }
 0x24d   : > { %v916_v10 = vmax.f32 %v912_v9, 0.0 }
 0x24e   : > { %v4442_v11 = vpop.f32.mrf.mxu0 }
 0x24f   : > { %918 = vrot.lane.b32.xlu1 %v916_v10, %s5145_s6  ;;  %v1205_v11 = vld [vmem:[%s6014_s1] sm:$0xff] }
 0x250   : > { %v1073_v22 = vpop.f32.mrf.mxu0 }
 0x251   : > { %v1148_v27 = vmul.f32 %v1073_v22, %v1073_v22  ;;  %v1158_v28 = vand.u32 2147483647, %v1073_v22  ;;  %vm1186_vm8 = vcmp.lt.f32.partialorder %v1073_v22, 0.0 }
 0x252   : > { %v4460_v23 = vpop.f32.mrf.mxu0 }
 0x2c1   : > { %v919_v14 = vpop.permute.xlu1 %918 }
 0x2c2   : > { %v921_v15 = vsel %vm826_vm2, 0.0, %v919_v14 }
 0x2c3   : > { %v922_v16 = vsel %vm828_vm3, %v921_v15, 0.0 }
 0x2c4   : > { %924 = vrot.lane.b32.xlu1 %v922_v16, %s5147_s7  ;;  %927 = vrot.lane.b32.xlu0 %v922_v16, %s5148_s2 }
 0x336   : > { %v928_v17 = vpop.permute.xlu0 %927  ;;  %v925_v18 = vpop.permute.xlu1 %924 }
 0x337   : > { %4446 = vmatpush3.msra.mxu1 %v928_v17 }
 0x338   : > { %4447 = vmatprep.subr.mxu1 %v5143_v0 }
 0x339   : > { %4448 = vmatpush3.msra.mxu1 %v925_v18 }
 0x33a   : > { %4449 = vmatprep.subr.mxu1 %v5143_v0 }
 0x33b   : > { %4450 = vmatpush3.msk.msra.mxu1 %vm828_vm3, %v921_v15 }
 0x33c   : > { %4452 = vmatmul.mubr.msk.f32.vlgmr.msra.gmra.mxu1 %vm5983_vm4, %v930_v19  ;;  %4461 = vmatprep.subr.mxu1 %v5143_v0  ;;  %v1380_v19 = vld [vmem:[%s6015_s28] sm:$0xff] }
 0x33d   : > { %4462 = vmatpush3.msra.mxu1 %v5476_v20  ;;  %4465 = vmatprep.mubr.msk.f32.mxu1 %vm5146_vm1, %v5143_v0 }
 0x33e   : > { %4463 = vmatprep.subr.mxu1 %v5143_v0 }
 0x33f   : > { %4464 = vmatpush3.msra.mxu1 %v5484_v21 }
 0x340   : > { %4466 = vmatmul.mubr.msk.f32.vlgmr.msra.gmra.mxu1 %vm1004_vm5, %v5420_v2  ;;  %4479 = vmatprep.subr.mxu1 %v5143_v0 }
 0x341   : > { %4480 = vmatpush3.msk.msra.mxu1 %vm842_vm0, %v5144_v1  ;;  %4487 = vmatprep.mubr.msk.f32.mxu1 %vm5146_vm1, %v5143_v0 }
 0x342   : > { %4481 = vmatprep.subr.mxu1 %v5143_v0 }
 0x3fc   : > { %v5499_v24 = vpop.f32.mrf.mxu1 }
 0x3fe   : > { %v4453_v25 = vpop.f32.mrf.mxu1 }
 0x400   : > { %v1143_v26 = vpop.f32.mrf.mxu1 }
 0x401   : > { %v1147_v29 = vsub.f32 0.0, %v1143_v26 }
 0x402   : > { %v4467_v30 = vpop.f32.mrf.mxu1 }
 0x403   : > { %v1149_v31 = vmul.f32 %v1147_v29, %v1147_v29  ;;  %v1159_v32 = vand.u32 2147483647, %v1147_v29  ;;  %vm1189_vm9 = vcmp.lt.f32.partialorder %v1147_v29, 0.0 }
 0x405   : > { %v1150_v33 = vadd.f32 %v1149_v31, %v1148_v27  ;;  %v1160_v34 = vmax.f32 %v1158_v28, %v1159_v32  ;;  %vm1183_vm6 = vcmp.gt.f32.partialorder %v1159_v32, %v1158_v28  ;;  %v1161_v36 = vmin.f32 %v1158_v28, %v1159_v32 }
 0x407   : > { %v1162_v35 = vmax.f32 %v1160_v34, 1e-30  ;;  %vm1153_vm10 = vcmp.eq.f32.partialorder %v1150_v33, inf  ;;  %v1156_v7 = vand.u32 2147483648, %v1150_v33  ;;  %vm1155_vm11 = vcmp.eq.f32.partialorder %v1150_v33, 0.0  ;;  %v1293_v34 = vld [vmem:[%s6016_s29] sm:$0xff]  ;;  %s816_s29 = scalar_lea.vmem %s5976_s23, %s6024_s25 }
 0x409   : > { %4824 = vrcp.f32 %v1162_v35 }
 0x416   : > { %v4825_v37 = vpop.eup %4824 }
 0x417   : > { %v1164_v38 = vmul.f32 %v4825_v37, %v1161_v36 }
 0x419   : > { %v1167_v39 = vadd.f32 1.0, %v1164_v38  ;;  %v4232_v40 = vadd.f32 -1.0, %v1164_v38  ;;  %vm1165_vm7 = vcmp.gt.f32.partialorder %v1164_v38, 0.41421357 }
 0x41b   : > { %4826 = vrcp.f32 %v1167_v39 }
 0x41c   : > { %4828 = vrsqrt.f32 %v1150_v33 }
 0x428   : > { %v4827_v41 = vpop.eup %4826 }
 0x429   : > { %v1169_v42 = vmul.f32 %v4827_v41, %v4232_v40  ;;  %v4829_v62 = vpop.eup %4828  ;;  %v1468_v40 = vld [vmem:[%s5961_s8] sm:$0xff] }
 0x42a   : > { %v1152_v63 = vmul.f32 %v4829_v62, %v1150_v33  ;;  %v5153_v62 = vmov 920167782  }
 0x42b   : > { %v1170_v43 = vsel %vm1165_vm7, %v1169_v42, %v1164_v38 }
 0x42c   : > { %v1171_v44 = vmul.f32 %v1170_v43, %v1170_v43  ;;  %v1154_v6 = vsel %vm1153_vm10, %v1150_v33, %v1152_v63 }
 0x42d   : > { %v1157_v8 = vsel %vm1155_vm11, %v1156_v7, %v1154_v6 }
 0x42e   : > { %v1172_v45 = vmul.f32 0.080537446, %v1171_v44 }
 0x430   : > { %v4233_v46 = vadd.f32 -0.13877685, %v1172_v45 }
 0x432   : > { %v1174_v47 = vmul.f32 %v4233_v46, %v1171_v44 }
 0x434   : > { %v1175_v48 = vadd.f32 0.19977711, %v1174_v47 }
 0x436   : > { %v1176_v49 = vmul.f32 %v1175_v48, %v1171_v44 }
 0x438   : > { %v4234_v50 = vadd.f32 -0.3333295, %v1176_v49 }
 0x43a   : > { %v1178_v51 = vmul.f32 %v4234_v50, %v1171_v44 }
 0x43c   : > { %v1179_v52 = vmul.f32 %v1178_v51, %v1170_v43 }
 0x43e   : > { %v1180_v53 = vadd.f32 %v1179_v52, %v1170_v43 }
 0x440   : > { %v1181_v54 = vadd.f32 0.7853982, %v1180_v53 }
 0x442   : > { %v1182_v55 = vsel %vm1165_vm7, %v1181_v54, %v1180_v53  ;;  %v5149_v54 = vmov 683565275  }
 0x443   : > { %v1184_v56 = vsub.f32 1.5707964, %v1182_v55 }
 0x445   : > { %v1185_v57 = vsel %vm1183_vm6, %v1184_v56, %v1182_v55  ;;  %v5150_v56 = vmov 2475754826  }
 0x446   : > { %v1187_v58 = vsub.f32 3.1415927, %v1185_v57 }
 0x448   : > { %v1188_v59 = vsel %vm1186_vm8, %v1187_v58, %v1185_v57  ;;  %v5151_v58 = vmov 2131351028  }
 0x449   : > { %v1190_v60 = vsub.f32 0.0, %v1188_v59 }
 0x44b   : > { %v1191_v61 = vsel %vm1189_vm9, %v1190_v60, %v1188_v59  ;;  %v5152_v60 = vmov 2102212464  }
 0x44c   : > { %1193 = vrot.lane.b32.xlu0 %v1191_v61, %s5145_s6 }
 0x4be   : > { %v1194_v3 = vpop.permute.xlu0 %1193 }
 0x4bf   : > { %v1196_v4 = vsel %vm826_vm2, 0.0, %v1194_v3 }
 0x4c0   : > { %v1197_v5 = vsel %vm828_vm3, %v1196_v4, 0.0 }
 0x4c1   : > { %1199 = vrot.lane.b32.xlu0 %v1197_v5, %s5147_s7  ;;  %1202 = vrot.lane.b32.xlu1 %v1197_v5, %s5148_s2 }
 0x4c5   : > { %1368 = vrot.lane.b32.xlu1 %v1157_v8, %s5145_s6  ;;  %v5154_v8 = vmov 1326507024  }
 0x533   : > { %v1203_v9 = vpop.permute.xlu1 %1202  ;;  %v1200_v10 = vpop.permute.xlu0 %1199 }
 0x534   : > { %4471 = vmatpush3.msra.mxu0 %v1203_v9 }
 0x535   : > { %4472 = vmatprep.subr.mxu0 %v5143_v0 }
 0x536   : > { %4473 = vmatpush3.msra.mxu0 %v1200_v10 }
 0x537   : > { %4474 = vmatprep.subr.mxu0 %v5143_v0  ;;  %v1369_v14 = vpop.permute.xlu1 %1368 }
 0x538   : > { %v1371_v15 = vsel %vm826_vm2, 0.0, %v1369_v14  ;;  %4475 = vmatpush3.msk.msra.mxu0 %vm828_vm3, %v1196_v4 }
 0x539   : > { %v1372_v16 = vsel %vm828_vm3, %v1371_v15, 0.0  ;;  %4477 = vmatmul.mubr.msk.f32.vlgmr.msra.gmra.mxu0 %vm5983_vm4, %v1205_v11  ;;  %4490 = vmatprep.subr.mxu0 %v5143_v0 }
 0x53a   : > { %1374 = vrot.lane.b32.xlu1 %v1372_v16, %s5147_s7  ;;  %1377 = vrot.lane.b32.xlu0 %v1372_v16, %s5148_s2 }
 0x53b   : > { %4491 = vmatpush3.msk.msra.mxu0 %vm842_vm0, %v5144_v1  ;;  %4498 = vmatprep.mubr.msk.f32.mxu0 %vm5146_vm1, %v5143_v0 }
 0x53c   : > { %4492 = vmatprep.subr.mxu0 %v5143_v0 }
 0x5ac   : > { %v1378_v17 = vpop.permute.xlu0 %1377  ;;  %v1375_v18 = vpop.permute.xlu1 %1374 }
 0x5ad   : > { %4493 = vmatpush3.msra.mxu0 %v1378_v17 }
 0x5ae   : > { %4494 = vmatprep.subr.mxu0 %v5143_v0 }
 0x5af   : > { %4495 = vmatpush3.msra.mxu0 %v1375_v18 }
 0x5b0   : > { %4496 = vmatprep.subr.mxu0 %v5143_v0 }
 0x5b1   : > { %4497 = vmatpush3.msk.msra.mxu0 %vm828_vm3, %v1371_v15 }
 0x5b2   : > { %4499 = vmatmul.mubr.msk.f32.vlgmr.msra.gmra.mxu0 %vm5983_vm4, %v1380_v19  ;;  %4512 = vmatprep.subr.mxu0 %v5143_v0 }
 0x5b3   : > { %4513 = vmatpush3.msra.mxu0 %v5446_v12  ;;  %4516 = vmatprep.mubr.msk.f32.mxu0 %vm5146_vm1, %v5143_v0 }
 0x5b4   : > { %4514 = vmatprep.subr.mxu0 %v5143_v0 }
 0x5b5   : > { %4515 = vmatpush3.msra.mxu0 %v5453_v13 }
 0x5b6   : > { %4526 = vmatprep.subr.mxu0 %v5143_v0 }
 0x5f9   : > { %v1275_v22 = vpop.f32.mrf.mxu0 }
 0x5fa   : > { %v1279_v23 = vmax.f32 %v1275_v22, 0.0 }
 0x5fb   : > { %v4478_v25 = vpop.f32.mrf.mxu0 }
 0x5fc   : > { %1281 = vrot.lane.b32.xlu0 %v1279_v23, %s5145_s6 }
 0x66e   : > { %v1282_v26 = vpop.permute.xlu0 %1281 }
 0x66f   : > { %v1284_v27 = vsel %vm826_vm2, 0.0, %v1282_v26 }
 0x670   : > { %v1285_v28 = vsel %vm828_vm3, %v1284_v27, 0.0 }
 0x671   : > { %1287 = vrot.lane.b32.xlu0 %v1285_v28, %s5147_s7  ;;  %1290 = vrot.lane.b32.xlu1 %v1285_v28, %s5148_s2 }
 0x672   : > { %v1450_v29 = vpop.f32.mrf.mxu0 }
 0x673   : > { %v1454_v30 = vmax.f32 %v1450_v29, 0.0 }
 0x674   : > { %v4500_v31 = vpop.f32.mrf.mxu0 }
 0x675   : > { %1456 = vrot.lane.b32.xlu1 %v1454_v30, %s5145_s6 }
 0x6e3   : > { %v1291_v32 = vpop.permute.xlu1 %1290  ;;  %v1288_v33 = vpop.permute.xlu0 %1287 }
 0x6e4   : > { %4482 = vmatpush3.msra.mxu1 %v1291_v32 }
 0x6e5   : > { %4483 = vmatprep.subr.mxu1 %v5143_v0 }
 0x6e6   : > { %4484 = vmatpush3.msra.mxu1 %v1288_v33 }
 0x6e7   : > { %4485 = vmatprep.subr.mxu1 %v5143_v0  ;;  %v1457_v35 = vpop.permute.xlu1 %1456 }
 0x6e8   : > { %v1459_v36 = vsel %vm826_vm2, 0.0, %v1457_v35  ;;  %4486 = vmatpush3.msk.msra.mxu1 %vm828_vm3, %v1284_v27 }
 0x6e9   : > { %v1460_v37 = vsel %vm828_vm3, %v1459_v36, 0.0  ;;  %4488 = vmatmul.mubr.msk.f32.vlgmr.msra.gmra.mxu1 %vm5983_vm4, %v1293_v34  ;;  %4501 = vmatprep.subr.mxu1 %v5143_v0 }
 0x6ea   : > { %1462 = vrot.lane.b32.xlu1 %v1460_v37, %s5147_s7  ;;  %1465 = vrot.lane.b32.xlu0 %v1460_v37, %s5148_s2 }
 0x6eb   : > { %4502 = vmatpush3.msk.msra.mxu1 %vm842_vm0, %v5144_v1  ;;  %4509 = vmatprep.mubr.msk.f32.mxu1 %vm5146_vm1, %v5143_v0 }
 0x6ec   : > { %4503 = vmatprep.subr.mxu1 %v5143_v0 }
 0x75c   : > { %v1466_v38 = vpop.permute.xlu0 %1465  ;;  %v1463_v39 = vpop.permute.xlu1 %1462 }
 0x75d   : > { %4504 = vmatpush3.msra.mxu1 %v1466_v38 }
 0x75e   : > { %4505 = vmatprep.subr.mxu1 %v5143_v0 }
 0x75f   : > { %4506 = vmatpush3.msra.mxu1 %v1463_v39 }
 0x760   : > { %4507 = vmatprep.subr.mxu1 %v5143_v0 }
 0x761   : > { %4508 = vmatpush3.msk.msra.mxu1 %vm828_vm3, %v1459_v36 }
 0x762   : > { %4510 = vmatmul.mubr.msk.f32.vlgmr.msra.gmra.mxu1 %vm5983_vm4, %v1468_v40  ;;  %4519 = vmatprep.subr.mxu1 %v5143_v0 }
 0x763   : > { %4520 = vmatpush3.msra.mxu1 %v5476_v20  ;;  %4523 = vmatprep.mubr.msk.f32.mxu1 %vm5146_vm1, %v5143_v0 }
 0x764   : > { %4521 = vmatprep.subr.mxu1 %v5143_v0 }
 0x765   : > { %4522 = vmatpush3.msra.mxu1 %v5484_v21 }
 0x766   : > { %4533 = vmatprep.subr.mxu1 %v5143_v0 }
 0x7a9   : > { %v5576_v41 = vpop.f32.mrf.mxu1 }
 0x7aa   : > { %v1545_v42 = vand.u32 2139095040, %v5576_v41  ;;  %v1542_v45 = vand.u32 2147483647, %v5576_v41  ;;  %vm1544_vm9 = vcmp.lt.s32.totalorder %v5576_v41, 0 }
 0x7ab   : > { %v4489_v43 = vpop.f32.mrf.mxu1 }
 0x7ac   : > { %v1546_v44 = vshrl.u32 %v1545_v42, 23  ;;  %v1549_v48 = vand.u32 8388607, %v1542_v45  ;;  %vm1543_vm10 = vcmp.le.f32.partialorder %v1542_v45, 0.7853982 }
 0x7ae   : > { %v4247_v46 = vadd.s32 4294967169, %v1546_v44  ;;  %v1550_v51 = vor.u32 8388608, %v1549_v48 }
 0x7b0   : > { %v1552_v47 = vadd.s32 1, %v4247_v46  ;;  %v1590_v10 = vshll.u32 %v1550_v51, 8 }
 0x7b2   : > { %vm1553_vm12 = vcmp.gt.s32.totalorder %v1552_v47, 0 }
 0x7b3   : > { %v1554_v49 = vsel %vm1553_vm12, %v1552_v47, 0 }
 0x7b4   : > { %v1556_v50 = vand.u32 31, %v1554_v49  ;;  %v1555_v52 = vshrl.u32 %v1554_v49, 5 }
 0x7b6   : > { %v1557_v53 = vsub.s32 32, %v1556_v50  ;;  %v1559_v55 = vshll.u32 %v5149_v54, %v1556_v50  ;;  %v1562_v57 = vshll.u32 %v5150_v56, %v1556_v50  ;;  %v1565_v59 = vshll.u32 %v5151_v58, %v1556_v50 }
 0x7b7   : > { %v1568_v61 = vshll.u32 %v5152_v60, %v1556_v50  ;;  %v1571_v63 = vshll.u32 %v5153_v62, %v1556_v50  ;;  %vm1574_vm13 = vcmp.lt.s32.totalorder %v1555_v52, 1  ;;  %vm1577_vm14 = vcmp.lt.s32.totalorder %v1555_v52, 4 }
 0x7b8   : > { %v1558_v3 = vshrl.u32 %v5149_v54, %v1557_v53  ;;  %v1560_v4 = vshrl.u32 %v5150_v56, %v1557_v53  ;;  %v1563_v5 = vshrl.u32 %v5151_v58, %v1557_v53  ;;  %v1566_v6 = vshrl.u32 %v5152_v60, %v1557_v53 }
 0x7b9   : > { %v1569_v7 = vshrl.u32 %v5153_v62, %v1557_v53  ;;  %v1572_v9 = vshrl.u32 %v5154_v8, %v1557_v53  ;;  %vm1575_vm15 = vcmp.lt.s32.totalorder %v1555_v52, 2  ;;  %vm1576_vm6 = vcmp.lt.s32.totalorder %v1555_v52, 3 }
 0x7ba   : > { %v1561_v11 = vor.u32 %v1560_v4, %v1559_v55  ;;  %v1564_v14 = vor.u32 %v1563_v5, %v1562_v57  ;;  %v1567_v15 = vor.u32 %v1566_v6, %v1565_v59 }
 0x7bb   : > { %v1570_v16 = vor.u32 %v1569_v7, %v1568_v61  ;;  %v1573_v17 = vor.u32 %v1572_v9, %v1571_v63 }
 0x7bc   : > { %v1578_v18 = vsel %vm1574_vm13, %v1558_v3, %v1561_v11  ;;  %v1579_v19 = vsel %vm1577_vm14, %v1567_v15, 2102212464  ;;  %v1582_v22 = vsel %vm1574_vm13, %v1561_v11, %v1564_v14  ;;  %v1586_v23 = vsel %vm1574_vm13, %v1564_v14, %v1567_v15 }
 0x7bd   : > { %v1580_v25 = vsel %vm1576_vm6, %v1564_v14, %v1579_v19  ;;  %v1583_v26 = vsel %vm1577_vm14, %v1570_v16, 920167782  ;;  %v1587_v27 = vsel %vm1577_vm14, %v1573_v17, 1326507024 }
 0x7be   : > { %v1584_v28 = vsel %vm1576_vm6, %v1567_v15, %v1583_v26  ;;  %v1588_v29 = vsel %vm1576_vm6, %v1570_v16, %v1587_v27  ;;  %v1581_v30 = vsel %vm1575_vm15, %v1578_v18, %v1580_v25 }
 0x7bf   : > { %v1585_v31 = vsel %vm1575_vm15, %v1582_v22, %v1584_v28  ;;  %v1589_v32 = vsel %vm1575_vm15, %v1586_v23, %v1588_v29  ;;  %v1597_v37 = vmul.u32 %v1590_v10, %v1581_v30 }
 0x7c0   : > { %v5593_v33 = vmul.u32.u64.low %v1590_v10, %v1589_v32  ;;  %v5594_v34 = vmul.u32.u64.high %v1590_v10, %v1589_v32, %v5593_v33  ;;  %v5596_v35 = vmul.u32.u64.low %v1590_v10, %v1585_v31  ;;  %v5597_v36 = vmul.u32.u64.high %v1590_v10, %v1585_v31, %v5596_v35 }
 0x7c2   : > { %vm1599_vm7 = vc.u32 %v5594_v34, %v5596_v35  ;;  %v1600_v38 = vadd.s32 1, %v5597_v36  ;;  %v1598_v55 = vadd.s32 %v5596_v35, %v5594_v34 }
 0x7c4   : > { %v1601_v39 = vsel %vm1599_vm7, %v1600_v38, %v5597_v36  ;;  %vm1634_vm7 = vweird.f32 %v5576_v41 }
 0x7c5   : > { %v1602_v40 = vadd.s32 %v1601_v39, %v1597_v37 }
 0x7c7   : > { %v1603_v42 = vadd.s32 536870912, %v1602_v40 }
 0x7c9   : > { %v1604_v43 = vshrl.u32 %v1603_v42, 30 }
 0x7cb   : > { %v1605_v44 = vshll.u32 %v1604_v43, 30  ;;  %v1628_v14 = vsub.s32 4, %v1604_v43 }
 0x7cd   : > { %v1606_v46 = vsub.s32 %v1602_v40, %v1605_v44  ;;  %v1629_v15 = vsel %vm1544_vm9, %v1628_v14, %v1604_v43 }
 0x7ce   : > { %v1631_v16 = vsel %vm1543_vm10, 0, %v1629_v15 }
 0x7cf   : > { %v1608_v47 = vsub.s32 0, %v1606_v46  ;;  %v1739_v17 = vadd.s32 3, %v1631_v16  ;;  %v1635_v22 = vand.u32 3, %v1631_v16 }
 0x7d1   : > { %v4248_v48 = vmin.u32 %v1608_v47, %v1606_v46  ;;  %v1740_v23 = vand.u32 3, %v1739_v17  ;;  %vm1637_vm11 = vcmp.eq.s32.totalorder %v1635_v22, 0  ;;  %vm1640_vm12 = vcmp.eq.s32.totalorder %v1635_v22, 2 }
 0x7d2   : > { %vm1636_vm15 = vcmp.lt.s32.totalorder %v1635_v22, 2 }
 0x7d3   : > { %v1610_v49 = vclz %v4248_v48  ;;  %vm1742_vm13 = vcmp.eq.s32.totalorder %v1740_v23, 0  ;;  %vm1745_vm14 = vcmp.eq.s32.totalorder %v1740_v23, 2  ;;  %vm1741_vm6 = vcmp.lt.s32.totalorder %v1740_v23, 2 }
 0x7d5   : > { %v4249_v50 = vadd.s32 4294967294, %v1610_v49 }
 0x7d7   : > { %vm4250_vm8 = vcmp.lt.s32.totalorder %v4249_v50, 0 }
 0x7d8   : > { %v1613_v51 = vsel %vm4250_vm8, 0, %v4249_v50 }
 0x7d9   : > { %v1618_v52 = vsub.s32 4294967266, %v1613_v51  ;;  %v1614_v57 = vsub.s32 32, %v1613_v51  ;;  %v1615_v61 = vshll.u32 %v1606_v46, %v1613_v51 }
 0x7db   : > { %v1619_v53 = vadd.s32 127, %v1618_v52  ;;  %v1616_v63 = vshrl.u32 %v1598_v55, %v1614_v57 }
 0x7dd   : > { %v1620_v59 = vshll.u32 %v1619_v53, 23  ;;  %v1617_v4 = vor.u32 %v1616_v63, %v1615_v61 }
 0x7df   : > { %v1621_v3 = vor.u32 4788187, %v1620_v59  ;;  %v1624_v6 = vcvt.s32.f32 %v1617_v4 }
 0x7e1   : > { %v1622_v5 = vand.u32 2147483647, %v1621_v3 }
 0x7e3   : > { %v1625_v7 = vmul.f32 %v1624_v6, %v1622_v5 }
 0x7e5   : > { %v1626_v9 = vxor.u32 2147483648, %v1625_v7 }
 0x7e7   : > { %v1627_v10 = vsel %vm1544_vm9, %v1626_v9, %v1625_v7 }
 0x7e8   : > { %v1630_v11 = vsel %vm1543_vm10, %v5576_v41, %v1627_v10  ;;  %vm2082_vm10 = vcmask 1041408  }
 0x7e9   : > { %4830 = vcosq.f32 %v1630_v11 }
 0x7ea   : > { %4832 = vsinq.f32 %v1630_v11 }
 0x7f6   : > { %v4831_v18 = vpop.eup %4830 }
 0x7f7   : > { %v4833_v19 = vpop.eup %4832  ;;  %v1641_v26 = vxor.u32 2147483648, %v4831_v18 }
 0x7f8   : > { %v1638_v25 = vxor.u32 2147483648, %v4833_v19 }
 0x7f9   : > { %v1642_v45 = vsel %vm1640_vm12, %v1641_v26, %v4833_v19  ;;  %v1747_v29 = vsel %vm1745_vm14, %v1641_v26, %v4833_v19  ;;  %vm2086_vm12 = vcmask 1045504   ;;  %vm5985_vm14 = vcmask 56320  }
 0x7fa   : > { %v1639_v27 = vsel %vm1637_vm11, %v4831_v18, %v1638_v25  ;;  %v1744_v28 = vsel %vm1742_vm13, %v4831_v18, %v1638_v25  ;;  %vm2084_vm11 = vcmask 1043456   ;;  %vm5986_vm13 = vcmask 1046528  }
 0x7fb   : > { %v1643_v30 = vsel %vm1636_vm15, %v1639_v27, %v1642_v45  ;;  %v1748_v31 = vsel %vm1741_vm6, %v1744_v28, %v1747_v29  ;;  %vm5984_vm15 = vcmask 72704   ;;  %vm5982_vm6 = vcmask 1044480  }
 0x7fc   : > { %v1644_v33 = vsel %vm1634_vm7, nan, %v1643_v30  ;;  %v1749_v34 = vsel %vm1634_vm7, nan, %v1748_v31  ;;  %vm5981_vm7 = vcmask 39936  }
 0x822   : > { %v1538_v32 = vpop.f32.mrf.mxu1 }
 0x823   : > { %v1645_v35 = vmul.f32 %v1644_v33, %v1538_v32  ;;  %v1750_v36 = vmul.f32 %v1749_v34, %v1538_v32  ;;  %v2088_v33 = vld [vmem:[#allocation2] sm:$0x1] }
 0x824   : > { %v4511_v37 = vpop.f32.mrf.mxu1 }
 0x825   : > { %4517 = vmatmul.mubr.msk.f32.vlgmr.msra.gmra.mxu0 %vm1004_vm5, %v1645_v35  ;;  %4524 = vmatmul.mubr.msk.f32.vlgmr.msra.gmra.mxu1 %vm1004_vm5, %v1750_v36 }
 0x826   : > { %4527 = vmatpush3.msra.mxu0 %v5446_v12  ;;  %4534 = vmatpush3.msra.mxu1 %v5476_v20 }
 0x827   : > { %4528 = vmatprep.subr.mxu0 %v5143_v0  ;;  %4535 = vmatprep.subr.mxu1 %v5143_v0 }
 0x828   : > { %4529 = vmatpush3.msra.mxu0 %v5453_v13  ;;  %4530 = vmatprep.mubr.msk.f32.mxu0 %vm5146_vm1, %v5143_v0 }
 0x829   : > { %4536 = vmatpush3.msra.mxu1 %v5484_v21  ;;  %4537 = vmatprep.mubr.msk.f32.mxu1 %vm5146_vm1, %v5143_v0 }
 0x82a   : > { %4531 = vmatmul.mubr.msk.f32.vlgmr.msra.gmra.mxu0 %vm1004_vm5, %v1750_v36  ;;  %4538 = vmatmul.mubr.msk.f32.vlgmr.msra.gmra.mxu1 %vm1004_vm5, %v1645_v35 }
 0x82b   : > { %4540 = vmatprep.subr.mxu0 %v5143_v0  ;;  %4542 = vmatprep.mubr.msk.f32.mxu0 %vm5146_vm1, %v5143_v0 }
 0x82c   : > { %4545 = vmatprep.subr.mxu1 %v5143_v0  ;;  %4549 = vmatprep.mubr.msk.f32.mxu1 %vm5146_vm1, %v5143_v0 }
 0x82d   : > { %4546 = vmatpush3.msk.msra.mxu1 %vm842_vm0, %v5144_v1 }
 0x82e   : > { %4547 = vmatprep.subr.mxu1 %v5143_v0 }
 0x8e5   : > { %v1820_v41 = vpop.f32.mrf.mxu0  ;;  %v1893_v38 = vpop.f32.mrf.mxu1 }
 0x8e6   : > { %v1897_v42 = vsub.f32 %v1820_v41, %v1893_v38 }
 0x8e7   : > { %v4518_v39 = vpop.f32.mrf.mxu0  ;;  %v4525_v40 = vpop.f32.mrf.mxu1 }
 0x8e8   : > { %v2038_v49 = vmul.f32 %v1897_v42, %v1897_v42  ;;  %v2172_v40 = vlaneseq }
 0x8ea   : > { %v1964_v43 = vpop.f32.mrf.mxu0  ;;  %v2034_v44 = vpop.f32.mrf.mxu1  ;;  %v5649_v42 = vshrl.u32 %v2172_v40, 7 }
 0x8eb   : > { %v2035_v46 = vadd.f32 %v2034_v44, %v1964_v43 }
 0x8ec   : > { %v4532_v47 = vpop.f32.mrf.mxu0  ;;  %v4539_v48 = vpop.f32.mrf.mxu1  ;;  %v2174_v43 = vsub.s32 0, %v5649_v42 }
 0x8ed   : > { %v2039_v50 = vmul.f32 %v2035_v46, %v2035_v46 }
 0x8ef   : > { %v2040_v51 = vadd.f32 %v2039_v50, %v2038_v49 }
 0x8f1   : > { %4834 = vrsqrt.f32 %v2040_v51  ;;  %vm2043_vm8 = vcmp.eq.f32.partialorder %v2040_v51, inf  ;;  %v2046_v55 = vand.u32 2147483648, %v2040_v51  ;;  %vm2045_vm9 = vcmp.eq.f32.partialorder %v2040_v51, 0.0 }
 0x8fe   : > { %v4835_v52 = vpop.eup %4834 }
 0x8ff   : > { %v2042_v53 = vmul.f32 %v4835_v52, %v2040_v51 }
 0x901   : > { %v2044_v57 = vsel %vm2043_vm8, %v2040_v51, %v2042_v53 }
 0x902   : > { %v2047_v59 = vsel %vm2045_vm9, %v2046_v55, %v2044_v57  ;;  %v2187_v55 = vld [vmem:[#allocation4] sm:$0xf] }
 0x903   : > { %v2048_v61 = vmul.f32 0.0625, %v2047_v59 }
 0x905   : > { %v2049_v63 = vsub.f32 %v2048_v61, %v5499_v24 }
 0x907   : > { %v2050_v3 = vsel %vm1004_vm5, %v2049_v63, 0.0  ;;  %v2059_v4 = vsel %vm1004_vm5, %v2049_v63, -inf }
 0x908   : > { %v2051_v5 = vrot.slane %v2050_v3, 4  ;;  %v2060_v6 = vrot.slane %v2059_v4, 4 }
 0x90a   : > { %v2052_v7 = vadd.f32 %v2051_v5, %v2050_v3  ;;  %v2061_v9 = vmax.f32 %v2059_v4, %v2060_v6  ;;  %v5155_v6 = vmov 0  }
 0x90b   : > { %4822 = vset.pattern.permute.xlu1 %v5155_v6  ;;  %4823 = vset.pattern.permute.xlu0 %v5155_v6 }
 0x90c   : > { %v2053_v10 = vrot.slane %v2052_v7, 2  ;;  %v2062_v11 = vrot.slane %v2061_v9, 2 }
 0x90e   : > { %v2054_v14 = vadd.f32 %v2053_v10, %v2052_v7  ;;  %v2063_v15 = vmax.f32 %v2061_v9, %v2062_v11 }
 0x910   : > { %v2055_v16 = vrot.slane %v2054_v14, 1  ;;  %v2064_v17 = vrot.slane %v2063_v15, 1 }
 0x912   : > { %v2056_v18 = vadd.f32 %v2055_v16, %v2054_v14  ;;  %v2065_v22 = vmax.f32 %v2063_v15, %v2064_v17 }
 0x914   : > { %v2058_v19 = vmul.f32 0.125, %v2056_v18 }
 0x916   : > { %v2066_v23 = vsel %vm842_vm0, %v2058_v19, %v2065_v22 }
 0x917   : > { %2068 = vrot.lane.b32.xlu0 %v2066_v23, %s5145_s6 }
 0x989   : > { %v2069_v25 = vpop.permute.xlu0 %2068 }
 0x98a   : > { %v2071_v26 = vsel %vm826_vm2, 0.0, %v2069_v25 }
 0x98b   : > { %v2072_v27 = vsel %vm828_vm3, %v2071_v26, 0.0 }
 0x98c   : > { %v2074_v45 = vrot.slane %v2072_v27, 6  ;;  %v2078_v28 = vrot.slane %v2072_v27, 4 }
 0x98e   : > { %2079 = vrot.lane.b32.xlu0 %v2078_v28, %s5148_s2  ;;  %2075 = vrot.lane.b32.xlu1 %v2074_v45, %s5147_s7 }
 0xa00   : > { %v2080_v29 = vpop.permute.xlu0 %2079  ;;  %v2076_v30 = vpop.permute.xlu1 %2075 }
 0xa01   : > { %v2083_v31 = vsel %vm2082_vm10, %v2072_v27, %v2076_v30 }
 0xa02   : > { %v2085_v32 = vsel %vm2084_vm11, %v2083_v31, %v2080_v29 }
 0xa03   : > { %v2087_v34 = vsel %vm2086_vm12, %v2085_v32, 1.0 }
 0xa04   : > { %4541 = vmatpush3.msk.msra.mxu0 %vm5986_vm13, %v2087_v34 }
 0xa05   : > { %4543 = vmatmul.mubr.msk.f32.vlgmr.msra.gmra.mxu0 %vm5985_vm14, %v2088_v33  ;;  %4552 = vmatprep.subr.mxu0 %v5143_v0 }
 0xa06   : > { %4554 = vmatprep.mubr.msk.f32.mxu0 %vm5146_vm1, %v5143_v0 }
 0xac5   : > { %v2163_v35 = vpop.f32.mrf.mxu0 }
 0xac6   : > { %v2167_v36 = vsub.f32 0.0, %v2163_v35  ;;  %v2461_v35 = vld [vmem:[#allocation6] sm:$0xff] }
 0xac7   : > { %v4544_v37 = vpop.f32.mrf.mxu0 }
 0xac8   : > { %v2168_v41 = vmul.f32 1.442695, %v2167_v36 }
 0xaca   : > { %4836 = vpow2.f32 %v2168_v41 }
 0xad7   : > { %v4837_v38 = vpop.eup %4836 }
 0xad8   : > { %v2170_v39 = vadd.f32 1.0, %v4837_v38 }
 0xada   : > { %4838 = vrcp.f32 %v2170_v39 }
 0xae7   : > { %v4839_v44 = vpop.eup %4838 }
 0xae8   : > { %v2175_v46 = vrot.slane %v4839_v44, %v2174_v43 }
 0xaea   : > { %v2176_v47 = vmul.f32 %v2175_v46, %v2049_v63  ;;  %v2264_v63 = vld [vmem:[%s5964_s11] sm:$0xff] }
 0xaec   : > { %v2177_v48 = vadd.f32 %v2176_v47, %v5499_v24 }
 0xaee   : > { %v2183_v49 = vsel %vm1004_vm5, %v2177_v48, -inf  ;;  %v2178_v50 = vsel %vm1004_vm5, %v2177_v48, 0.0 }
 0xaef   : > { %2184 = vmax.xlane.f32.xlu0 %v2183_v49  ;;  %2179 = vadd.xlane.f32.xlu1 %v2178_v50 }
 0xb78   : > { %v2180_v51 = vpop.xlane.xlu1 %2179  ;;  %v2185_v53 = vpop.xlane.xlu0 %2184 }
 0xb79   : > { %v2182_v52 = vmul.f32 0.0625, %v2180_v51 }
 0xb7b   : > { %v2186_v57 = vsel %vm826_vm2, %v2182_v52, %v2185_v53 }
 0xb7c   : > { %4548 = vmatpush3.msra.mxu1 %v2186_v57 }
 0xb7d   : > { %4550 = vmatmul.mubr.msk.f32.vlgmr.msra.gmra.mxu1 %vm5984_vm15, %v2187_v55  ;;  %4557 = vmatprep.subr.mxu1 %v5143_v0 }
 0xb7e   : > { %4558 = vmatpush3.msk.msra.mxu1 %vm842_vm0, %v5144_v1  ;;  %4565 = vmatprep.mubr.msk.f32.mxu1 %vm5146_vm1, %v5143_v0 }
 0xb7f   : > { %4559 = vmatprep.subr.mxu1 %v5143_v0 }
 0xc3d   : > { %v2258_v24 = vpop.f32.mrf.mxu1 }
 0xc3e   : > { %v2262_v59 = vmax.f32 %v2258_v24, 0.0 }
 0xc3f   : > { %v4551_v61 = vpop.f32.mrf.mxu1 }
 0xc40   : > { %v2263_v3 = vsel %vm2084_vm11, %v2262_v59, 1.0 }
 0xc41   : > { %4553 = vmatpush3.msk.msra.mxu0 %vm5982_vm6, %v2263_v3 }
 0xc42   : > { %4555 = vmatmul.mubr.msk.f32.vlgmr.msra.gmra.mxu0 %vm5981_vm7, %v2264_v63  ;;  %4568 = vmatprep.subr.mxu0 %v5143_v0 }
 0xc43   : > { %4569 = vmatpush3.msk.msra.mxu0 %vm842_vm0, %v5144_v1  ;;  %4576 = vmatprep.mubr.msk.f32.mxu0 %vm5146_vm1, %v5143_v0 }
 0xc44   : > { %4570 = vmatprep.subr.mxu0 %v5143_v0 }
 0xd02   : > { %v2339_v4 = vpop.f32.mrf.mxu0 }
 0xd03   : > { %2344 = vrot.lane.b32.xlu0 %v2339_v4, %s5147_s7 }
 0xd04   : > { %v4556_v5 = vpop.f32.mrf.mxu0 }
 0xd75   : > { %v2345_v7 = vpop.permute.xlu0 %2344 }
 0xd76   : > { %v2347_v9 = vadd.f32 %v2345_v7, %v2339_v4 }
 0xd78   : > { %v2348_v10 = vsub.f32 0.0, %v2347_v9 }
 0xd7a   : > { %v2349_v11 = vmul.f32 1.442695, %v2348_v10 }
 0xd7c   : > { %4840 = vpow2.f32 %v2349_v11 }
 0xd89   : > { %v4841_v14 = vpop.eup %4840 }
 0xd8a   : > { %v2351_v15 = vadd.f32 1.0, %v4841_v14 }
 0xd8c   : > { %4842 = vrcp.f32 %v2351_v15 }
 0xd99   : > { %v4843_v16 = vpop.eup %4842 }
 0xd9a   : > { %2355 = vperm.xlu1 %4822, %v4843_v16  }
 0xe15   : > { %v2356_v17 = vpop.permute.xlu1 %2355 }
 0xe16   : > { %v2358_v18 = vmul.f32 %v2356_v17, %v2177_v48 }
 0xe18   : > { %v5679_v19 = vadd.f32 %v2358_v18, %v5420_v2  ;;  %v2373_v2 = vld [vmem:[%s5965_s12] sm:$0xff] }
 0xe1a   : > { %2361 = vrot.lane.b32.xlu1 %v5679_v19, %s5145_s6 }
 0xe8c   : > { %v2362_v22 = vpop.permute.xlu1 %2361 }
 0xe8d   : > { %v2364_v23 = vsel %vm826_vm2, 0.0, %v2362_v22 }
 0xe8e   : > { %v2365_v25 = vsel %vm828_vm3, %v2364_v23, 0.0 }
 0xe8f   : > { %2367 = vrot.lane.b32.xlu1 %v2365_v25, %s5147_s7  ;;  %2370 = vrot.lane.b32.xlu0 %v2365_v25, %s5148_s2 }
 0xf01   : > { %v2371_v26 = vpop.permute.xlu0 %2370  ;;  %v2368_v27 = vpop.permute.xlu1 %2367 }
 0xf02   : > { %4560 = vmatpush3.msra.mxu1 %v2371_v26 }
 0xf03   : > { %4561 = vmatprep.subr.mxu1 %v5143_v0 }
 0xf04   : > { %4562 = vmatpush3.msra.mxu1 %v2368_v27 }
 0xf05   : > { %4563 = vmatprep.subr.mxu1 %v5143_v0 }
 0xf06   : > { %4564 = vmatpush3.msk.msra.mxu1 %vm828_vm3, %v2364_v23 }
 0xf07   : > { %4566 = vmatmul.mubr.msk.f32.vlgmr.msra.gmra.mxu1 %vm5983_vm4, %v2373_v2  ;;  %4579 = vmatprep.subr.mxu1 %v5143_v0 }
 0xf08   : > { %4580 = vmatpush3.msra.mxu1 %v5446_v12  ;;  %4583 = vmatprep.mubr.msk.f32.mxu1 %vm5146_vm1, %v5143_v0 }
 0xf09   : > { %4581 = vmatprep.subr.mxu1 %v5143_v0 }
 0xf0a   : > { %4582 = vmatpush3.msra.mxu1 %v5453_v13 }
 0xf0b   : > { %4584 = vmatmul.mubr.msk.f32.vlgmr.msra.gmra.mxu1 %vm1004_vm5, %v5679_v19  ;;  %4593 = vmatprep.subr.mxu1 %v5143_v0 }
 0xf0c   : > { %4594 = vmatpush3.msk.msra.mxu1 %vm842_vm0, %v5144_v1  ;;  %4601 = vmatprep.mubr.msk.f32.mxu1 %vm5146_vm1, %v5143_v0 }
 0xf0d   : > { %4595 = vmatprep.subr.mxu1 %v5143_v0 }
 0xfc7   : > { %v2443_v12 = vpop.f32.mrf.mxu1 }
 0xfc8   : > { %v2447_v45 = vmax.f32 %v2443_v12, 0.0 }
 0xfc9   : > { %v4567_v28 = vpop.f32.mrf.mxu1 }
 0xfca   : > { %2449 = vrot.lane.b32.xlu0 %v2447_v45, %s5145_s6 }
 0xfcb   : > { %v5709_v29 = vpop.f32.mrf.mxu1 }
 0xfcc   : > { %v2688_v39 = vand.u32 2147483647, %v5709_v29  ;;  %vm2716_vm7 = vcmp.lt.f32.partialorder %v5709_v29, 0.0 }
 0xfcd   : > { %v4585_v13 = vpop.f32.mrf.mxu1 }
0x103c   : > { %v2450_v30 = vpop.permute.xlu0 %2449 }
0x103d   : > { %v2452_v31 = vsel %vm826_vm2, 0.0, %v2450_v30 }
0x103e   : > { %v2453_v32 = vsel %vm828_vm3, %v2452_v31, 0.0 }
0x103f   : > { %2455 = vrot.lane.b32.xlu0 %v2453_v32, %s5147_s7  ;;  %2458 = vrot.lane.b32.xlu1 %v2453_v32, %s5148_s2  ;;  %v2735_v32 = vld [vmem:[#allocation7] sm:$0xff] }
0x10b1   : > { %v2459_v33 = vpop.permute.xlu1 %2458  ;;  %v2456_v34 = vpop.permute.xlu0 %2455 }
0x10b2   : > { %4571 = vmatpush3.msra.mxu0 %v2459_v33 }
0x10b3   : > { %4572 = vmatprep.subr.mxu0 %v5143_v0 }
0x10b4   : > { %4573 = vmatpush3.msra.mxu0 %v2456_v34 }
0x10b5   : > { %4574 = vmatprep.subr.mxu0 %v5143_v0 }
0x10b6   : > { %4575 = vmatpush3.msk.msra.mxu0 %vm828_vm3, %v2452_v31 }
0x10b7   : > { %4577 = vmatmul.mubr.msk.f32.vlgmr.msra.gmra.mxu0 %vm5983_vm4, %v2461_v35  ;;  %4586 = vmatprep.subr.mxu0 %v5143_v0 }
0x10b8   : > { %4587 = vmatpush3.msra.mxu0 %v5476_v20  ;;  %4590 = vmatprep.mubr.msk.f32.mxu0 %vm5146_vm1, %v5143_v0 }
0x10b9   : > { %4588 = vmatprep.subr.mxu0 %v5143_v0 }
0x10ba   : > { %4589 = vmatpush3.msra.mxu0 %v5484_v21  ;;  %v2678_v21 = vmul.f32 %v5709_v29, %v5709_v29 }
0x10bb   : > { %4591 = vmatmul.mubr.msk.f32.vlgmr.msra.gmra.mxu0 %vm1004_vm5, %v5679_v19  ;;  %4604 = vmatprep.subr.mxu0 %v5143_v0 }
0x10bc   : > { %4605 = vmatpush3.msk.msra.mxu0 %vm842_vm0, %v5144_v1  ;;  %4612 = vmatprep.mubr.msk.f32.mxu0 %vm5146_vm1, %v5143_v0 }
0x10bd   : > { %4606 = vmatprep.subr.mxu0 %v5143_v0 }
0x1177   : > { %v5733_v20 = vpop.f32.mrf.mxu0 }
0x1179   : > { %v4578_v36 = vpop.f32.mrf.mxu0 }
0x117b   : > { %v2673_v37 = vpop.f32.mrf.mxu0 }
0x117c   : > { %v2677_v41 = vsub.f32 0.0, %v2673_v37 }
0x117d   : > { %v4592_v38 = vpop.f32.mrf.mxu0 }
0x117e   : > { %v2679_v44 = vmul.f32 %v2677_v41, %v2677_v41  ;;  %v2689_v46 = vand.u32 2147483647, %v2677_v41  ;;  %vm2719_vm6 = vcmp.lt.f32.partialorder %v2677_v41, 0.0  ;;  %v2910_v41 = vld [vmem:[%s5969_s16] sm:$0xff]  ;;  %v5771_v38 = vld [vmem:[%s6011_s5 + $0x8] sm:$0xff] }
0x1180   : > { %v2680_v47 = vadd.f32 %v2679_v44, %v2678_v21  ;;  %v2690_v48 = vmax.f32 %v2688_v39, %v2689_v46  ;;  %vm2713_vm8 = vcmp.gt.f32.partialorder %v2689_v46, %v2688_v39  ;;  %v2691_v50 = vmin.f32 %v2688_v39, %v2689_v46  ;;  %v5780_v21 = vld [vmem:[%s6011_s5] sm:$0xff] }
0x1182   : > { %v2692_v49 = vmax.f32 %v2690_v48, 1e-30  ;;  %v2686_v29 = vand.u32 2147483648, %v2680_v47 }
0x1184   : > { %4844 = vrcp.f32 %v2692_v49 }
0x1191   : > { %v4845_v51 = vpop.eup %4844 }
0x1192   : > { %v2694_v52 = vmul.f32 %v4845_v51, %v2691_v50 }
0x1194   : > { %v2697_v53 = vadd.f32 1.0, %v2694_v52  ;;  %v4273_v55 = vadd.f32 -1.0, %v2694_v52  ;;  %vm2695_vm9 = vcmp.gt.f32.partialorder %v2694_v52, 0.41421357 }
0x1196   : > { %4846 = vrcp.f32 %v2697_v53 }
0x1197   : > { %4848 = vrsqrt.f32 %v2680_v47 }
0x11a3   : > { %v4847_v57 = vpop.eup %4846 }
0x11a4   : > { %v2699_v24 = vmul.f32 %v4847_v57, %v4273_v55  ;;  %v4849_v26 = vpop.eup %4848  ;;  %v2823_v57 = vld [vmem:[#allocation9] sm:$0xff] }
0x11a5   : > { %v2682_v27 = vmul.f32 %v4849_v26, %v2680_v47 }
0x11a6   : > { %v2700_v59 = vsel %vm2695_vm9, %v2699_v24, %v2694_v52 }
0x11a7   : > { %v2701_v61 = vmul.f32 %v2700_v59, %v2700_v59 }
0x11a9   : > { %v2702_v63 = vmul.f32 0.080537446, %v2701_v61 }
0x11ab   : > { %v4274_v3 = vadd.f32 -0.13877685, %v2702_v63 }
0x11ad   : > { %v2704_v4 = vmul.f32 %v4274_v3, %v2701_v61 }
0x11af   : > { %v2705_v5 = vadd.f32 0.19977711, %v2704_v4  ;;  %v2998_v4 = vld [vmem:[#allocation10] sm:$0xff] }
0x11b1   : > { %v2706_v6 = vmul.f32 %v2705_v5, %v2701_v61  ;;  %v5812_v5 = vld [vmem:[%s6013_s30 + $0x8] sm:$0xff] }
0x11b3   : > { %v4275_v7 = vadd.f32 -0.3333295, %v2706_v6  ;;  %v5821_v6 = vld [vmem:[%s6013_s30] sm:$0xff] }
0x11b5   : > { %v2708_v9 = vmul.f32 %v4275_v7, %v2701_v61 }
0x11b7   : > { %v2709_v10 = vmul.f32 %v2708_v9, %v2700_v59 }
0x11b9   : > { %v2710_v11 = vadd.f32 %v2709_v10, %v2700_v59 }
0x11bb   : > { %v2711_v14 = vadd.f32 0.7853982, %v2710_v11 }
0x11bd   : > { %v2712_v15 = vsel %vm2695_vm9, %v2711_v14, %v2710_v11  ;;  %vm2683_vm9 = vcmp.eq.f32.partialorder %v2680_v47, inf }
0x11be   : > { %v2714_v16 = vsub.f32 1.5707964, %v2712_v15  ;;  %v2684_v28 = vsel %vm2683_vm9, %v2680_v47, %v2682_v27 }
0x11c0   : > { %v2715_v17 = vsel %vm2713_vm8, %v2714_v16, %v2712_v15 }
0x11c1   : > { %v2717_v18 = vsub.f32 3.1415927, %v2715_v17 }
0x11c3   : > { %v2718_v22 = vsel %vm2716_vm7, %v2717_v18, %v2715_v17  ;;  %vm2685_vm7 = vcmp.eq.f32.partialorder %v2680_v47, 0.0 }
0x11c4   : > { %v2720_v23 = vsub.f32 0.0, %v2718_v22  ;;  %v2687_v13 = vsel %vm2685_vm7, %v2686_v29, %v2684_v28 }
0x11c6   : > { %v2721_v25 = vsel %vm2719_vm6, %v2720_v23, %v2718_v22 }
0x11c7   : > { %2723 = vrot.lane.b32.xlu1 %v2721_v25, %s5145_s6 }
0x1239   : > { %v2724_v2 = vpop.permute.xlu1 %2723 }
0x123a   : > { %v2726_v12 = vsel %vm826_vm2, 0.0, %v2724_v2 }
0x123b   : > { %v2727_v45 = vsel %vm828_vm3, %v2726_v12, 0.0 }
0x123c   : > { %2729 = vrot.lane.b32.xlu1 %v2727_v45, %s5147_s7  ;;  %2732 = vrot.lane.b32.xlu0 %v2727_v45, %s5148_s2 }
0x1240   : > { %2898 = vrot.lane.b32.xlu0 %v2687_v13, %s5145_s6 }
0x12ae   : > { %v2733_v30 = vpop.permute.xlu0 %2732  ;;  %v2730_v31 = vpop.permute.xlu1 %2729 }
0x12af   : > { %4596 = vmatpush3.msra.mxu1 %v2733_v30 }
0x12b0   : > { %4597 = vmatprep.subr.mxu1 %v5143_v0 }
0x12b1   : > { %4598 = vmatpush3.msra.mxu1 %v2730_v31 }
0x12b2   : > { %4599 = vmatprep.subr.mxu1 %v5143_v0  ;;  %v2899_v33 = vpop.permute.xlu0 %2898 }
0x12b3   : > { %v2901_v34 = vsel %vm826_vm2, 0.0, %v2899_v33  ;;  %4600 = vmatpush3.msk.msra.mxu1 %vm828_vm3, %v2726_v12 }
0x12b4   : > { %v2902_v35 = vsel %vm828_vm3, %v2901_v34, 0.0  ;;  %4602 = vmatmul.mubr.msk.f32.vlgmr.msra.gmra.mxu1 %vm5983_vm4, %v2735_v32  ;;  %4615 = vmatprep.subr.mxu1 %v5143_v0 }
0x12b5   : > { %2904 = vrot.lane.b32.xlu0 %v2902_v35, %s5147_s7  ;;  %2907 = vrot.lane.b32.xlu1 %v2902_v35, %s5148_s2 }
0x12b6   : > { %4616 = vmatpush3.msk.msra.mxu1 %vm842_vm0, %v5144_v1  ;;  %4623 = vmatprep.mubr.msk.f32.mxu1 %vm5146_vm1, %v5143_v0 }
0x12b7   : > { %4617 = vmatprep.subr.mxu1 %v5143_v0 }
0x1327   : > { %v2908_v36 = vpop.permute.xlu1 %2907  ;;  %v2905_v37 = vpop.permute.xlu0 %2904 }
0x1328   : > { %4618 = vmatpush3.msra.mxu1 %v2908_v36 }
0x1329   : > { %4619 = vmatprep.subr.mxu1 %v5143_v0 }
0x132a   : > { %4620 = vmatpush3.msra.mxu1 %v2905_v37 }
0x132b   : > { %4621 = vmatprep.subr.mxu1 %v5143_v0 }
0x132c   : > { %4622 = vmatpush3.msk.msra.mxu1 %vm828_vm3, %v2901_v34 }
0x132d   : > { %4624 = vmatmul.mubr.msk.f32.vlgmr.msra.gmra.mxu1 %vm5983_vm4, %v2910_v41  ;;  %4637 = vmatprep.subr.mxu1 %v5143_v0 }
0x132e   : > { %4638 = vmatpush3.msra.mxu1 %v5771_v38  ;;  %4641 = vmatprep.mubr.msk.f32.mxu1 %vm5146_vm1, %v5143_v0 }
0x132f   : > { %4639 = vmatprep.subr.mxu1 %v5143_v0 }
0x1330   : > { %4640 = vmatpush3.msra.mxu1 %v5780_v21 }
0x1331   : > { %4651 = vmatprep.subr.mxu1 %v5143_v0 }
0x1374   : > { %v2805_v39 = vpop.f32.mrf.mxu1 }
0x1375   : > { %v2809_v44 = vmax.f32 %v2805_v39, 0.0 }
0x1376   : > { %v4603_v46 = vpop.f32.mrf.mxu1 }
0x1377   : > { %2811 = vrot.lane.b32.xlu1 %v2809_v44, %s5145_s6 }
0x13e9   : > { %v2812_v47 = vpop.permute.xlu1 %2811 }
0x13ea   : > { %v2814_v48 = vsel %vm826_vm2, 0.0, %v2812_v47 }
0x13eb   : > { %v2815_v49 = vsel %vm828_vm3, %v2814_v48, 0.0 }
0x13ec   : > { %2817 = vrot.lane.b32.xlu1 %v2815_v49, %s5147_s7  ;;  %2820 = vrot.lane.b32.xlu0 %v2815_v49, %s5148_s2 }
0x13ed   : > { %v2980_v50 = vpop.f32.mrf.mxu1 }
0x13ee   : > { %v2984_v51 = vmax.f32 %v2980_v50, 0.0 }
0x13ef   : > { %v4625_v52 = vpop.f32.mrf.mxu1 }
0x13f0   : > { %2986 = vrot.lane.b32.xlu0 %v2984_v51, %s5145_s6 }
0x145e   : > { %v2821_v53 = vpop.permute.xlu0 %2820  ;;  %v2818_v55 = vpop.permute.xlu1 %2817 }
0x145f   : > { %4607 = vmatpush3.msra.mxu0 %v2821_v53 }
0x1460   : > { %4608 = vmatprep.subr.mxu0 %v5143_v0 }
0x1461   : > { %4609 = vmatpush3.msra.mxu0 %v2818_v55 }
0x1462   : > { %4610 = vmatprep.subr.mxu0 %v5143_v0  ;;  %v2987_v24 = vpop.permute.xlu0 %2986 }
0x1463   : > { %v2989_v59 = vsel %vm826_vm2, 0.0, %v2987_v24  ;;  %4611 = vmatpush3.msk.msra.mxu0 %vm828_vm3, %v2814_v48 }
0x1464   : > { %v2990_v61 = vsel %vm828_vm3, %v2989_v59, 0.0  ;;  %4613 = vmatmul.mubr.msk.f32.vlgmr.msra.gmra.mxu0 %vm5983_vm4, %v2823_v57  ;;  %4626 = vmatprep.subr.mxu0 %v5143_v0 }
0x1465   : > { %2992 = vrot.lane.b32.xlu0 %v2990_v61, %s5147_s7  ;;  %2995 = vrot.lane.b32.xlu1 %v2990_v61, %s5148_s2 }
0x1466   : > { %4627 = vmatpush3.msk.msra.mxu0 %vm842_vm0, %v5144_v1  ;;  %4634 = vmatprep.mubr.msk.f32.mxu0 %vm5146_vm1, %v5143_v0 }
0x1467   : > { %4628 = vmatprep.subr.mxu0 %v5143_v0 }
0x14d7   : > { %v2996_v63 = vpop.permute.xlu1 %2995  ;;  %v2993_v3 = vpop.permute.xlu0 %2992 }
0x14d8   : > { %4629 = vmatpush3.msra.mxu0 %v2996_v63 }
0x14d9   : > { %4630 = vmatprep.subr.mxu0 %v5143_v0 }
0x14da   : > { %4631 = vmatpush3.msra.mxu0 %v2993_v3 }
0x14db   : > { %4632 = vmatprep.subr.mxu0 %v5143_v0 }
0x14dc   : > { %4633 = vmatpush3.msk.msra.mxu0 %vm828_vm3, %v2989_v59 }
0x14dd   : > { %4635 = vmatmul.mubr.msk.f32.vlgmr.msra.gmra.mxu0 %vm5983_vm4, %v2998_v4  ;;  %4644 = vmatprep.subr.mxu0 %v5143_v0 }
0x14de   : > { %4645 = vmatpush3.msra.mxu0 %v5812_v5  ;;  %4648 = vmatprep.mubr.msk.f32.mxu0 %vm5146_vm1, %v5143_v0 }
0x14df   : > { %4646 = vmatprep.subr.mxu0 %v5143_v0 }
0x14e0   : > { %4647 = vmatpush3.msra.mxu0 %v5821_v6 }
0x14e1   : > { %4658 = vmatprep.subr.mxu0 %v5143_v0 }
0x1524   : > { %v5825_v7 = vpop.f32.mrf.mxu0 }
0x1525   : > { %v3075_v9 = vand.u32 2139095040, %v5825_v7  ;;  %v3072_v14 = vand.u32 2147483647, %v5825_v7 }
0x1526   : > { %v4614_v10 = vpop.f32.mrf.mxu0 }
0x1527   : > { %v3076_v11 = vshrl.u32 %v3075_v9, 23  ;;  %v3079_v17 = vand.u32 8388607, %v3072_v14 }
0x1529   : > { %v4288_v15 = vadd.s32 4294967169, %v3076_v11  ;;  %v3080_v23 = vor.u32 8388608, %v3079_v17 }
0x152b   : > { %v3082_v16 = vadd.s32 1, %v4288_v15  ;;  %v3120_v34 = vshll.u32 %v3080_v23, 8 }
0x152d   : > { %vm3083_vm6 = vcmp.gt.s32.totalorder %v3082_v16, 0 }
0x152e   : > { %v3084_v18 = vsel %vm3083_vm6, %v3082_v16, 0 }
0x152f   : > { %v3086_v22 = vand.u32 31, %v3084_v18  ;;  %v3085_v25 = vshrl.u32 %v3084_v18, 5 }
0x1531   : > { %v3087_v26 = vsub.s32 32, %v3086_v22  ;;  %v3089_v27 = vshll.u32 %v5149_v54, %v3086_v22  ;;  %v3092_v2 = vshll.u32 %v5150_v56, %v3086_v22  ;;  %v3095_v12 = vshll.u32 %v5151_v58, %v3086_v22 }
0x1532   : > { %v3098_v45 = vshll.u32 %v5152_v60, %v3086_v22  ;;  %v3101_v28 = vshll.u32 %v5153_v62, %v3086_v22  ;;  %vm3104_vm8 = vcmp.lt.s32.totalorder %v3085_v25, 1  ;;  %vm3107_vm9 = vcmp.lt.s32.totalorder %v3085_v25, 4 }
0x1533   : > { %v3088_v29 = vshrl.u32 %v5149_v54, %v3087_v26  ;;  %v3090_v13 = vshrl.u32 %v5150_v56, %v3087_v26  ;;  %v3093_v30 = vshrl.u32 %v5151_v58, %v3087_v26  ;;  %v3096_v31 = vshrl.u32 %v5152_v60, %v3087_v26 }
0x1534   : > { %v3099_v32 = vshrl.u32 %v5153_v62, %v3087_v26  ;;  %v3102_v33 = vshrl.u32 %v5154_v8, %v3087_v26  ;;  %vm3105_vm7 = vcmp.lt.s32.totalorder %v3085_v25, 2  ;;  %vm3106_vm6 = vcmp.lt.s32.totalorder %v3085_v25, 3 }
0x1535   : > { %v3091_v35 = vor.u32 %v3090_v13, %v3089_v27  ;;  %v3094_v36 = vor.u32 %v3093_v30, %v3092_v2  ;;  %v3097_v37 = vor.u32 %v3096_v31, %v3095_v12 }
0x1536   : > { %v3100_v41 = vor.u32 %v3099_v32, %v3098_v45  ;;  %v3103_v39 = vor.u32 %v3102_v33, %v3101_v28 }
0x1537   : > { %v3108_v54 = vsel %vm3104_vm8, %v3088_v29, %v3091_v35  ;;  %v3109_v56 = vsel %vm3107_vm9, %v3097_v37, 2102212464  ;;  %v3112_v44 = vsel %vm3104_vm8, %v3091_v35, %v3094_v36  ;;  %v3116_v58 = vsel %vm3104_vm8, %v3094_v36, %v3097_v37 }
0x1538   : > { %v3110_v46 = vsel %vm3106_vm6, %v3094_v36, %v3109_v56  ;;  %v3113_v60 = vsel %vm3107_vm9, %v3100_v41, 920167782  ;;  %v3117_v47 = vsel %vm3107_vm9, %v3103_v39, 1326507024  ;;  %vm3073_vm9 = vcmp.le.f32.partialorder %v3072_v14, 0.7853982 }
0x1539   : > { %v3114_v62 = vsel %vm3106_vm6, %v3097_v37, %v3113_v60  ;;  %v3118_v48 = vsel %vm3106_vm6, %v3100_v41, %v3117_v47  ;;  %v3111_v8 = vsel %vm3105_vm7, %v3108_v54, %v3110_v46 }
0x153a   : > { %v3115_v49 = vsel %vm3105_vm7, %v3112_v44, %v3114_v62  ;;  %v3119_v50 = vsel %vm3105_vm7, %v3116_v58, %v3118_v48  ;;  %v3127_v57 = vmul.u32 %v3120_v34, %v3111_v8 }
0x153b   : > { %v5842_v51 = vmul.u32.u64.low %v3120_v34, %v3119_v50  ;;  %v5843_v52 = vmul.u32.u64.high %v3120_v34, %v3119_v50, %v5842_v51  ;;  %v5845_v53 = vmul.u32.u64.low %v3120_v34, %v3115_v49  ;;  %v5846_v55 = vmul.u32.u64.high %v3120_v34, %v3115_v49, %v5845_v53 }
0x153d   : > { %vm3129_vm4 = vc.u32 %v5843_v52, %v5845_v53  ;;  %v3130_v24 = vadd.s32 1, %v5846_v55  ;;  %v3128_v23 = vadd.s32 %v5845_v53, %v5843_v52 }
0x153f   : > { %v3131_v59 = vsel %vm3129_vm4, %v3130_v24, %v5846_v55  ;;  %vm3074_vm4 = vcmp.lt.s32.totalorder %v5825_v7, 0 }
0x1540   : > { %v3132_v61 = vadd.s32 %v3131_v59, %v3127_v57 }
0x1542   : > { %v3133_v63 = vadd.s32 536870912, %v3132_v61 }
0x1544   : > { %v3134_v3 = vshrl.u32 %v3133_v63, 30 }
0x1546   : > { %v3135_v4 = vshll.u32 %v3134_v3, 30  ;;  %v3158_v33 = vsub.s32 4, %v3134_v3 }
0x1548   : > { %v3136_v9 = vsub.s32 %v3132_v61, %v3135_v4  ;;  %v3159_v34 = vsel %vm3074_vm4, %v3158_v33, %v3134_v3 }
0x1549   : > { %v3161_v35 = vsel %vm3073_vm9, 0, %v3159_v34 }
0x154a   : > { %v3138_v10 = vsub.s32 0, %v3136_v9  ;;  %v3269_v36 = vadd.s32 3, %v3161_v35  ;;  %v3165_v39 = vand.u32 3, %v3161_v35 }
0x154c   : > { %v4289_v11 = vmin.u32 %v3138_v10, %v3136_v9  ;;  %v3270_v54 = vand.u32 3, %v3269_v36  ;;  %vm3167_vm7 = vcmp.eq.s32.totalorder %v3165_v39, 0  ;;  %vm3170_vm6 = vcmp.eq.s32.totalorder %v3165_v39, 2 }
0x154d   : > { %vm3166_vm14 = vcmp.lt.s32.totalorder %v3165_v39, 2 }
0x154e   : > { %v3140_v15 = vclz %v4289_v11  ;;  %vm3275_vm15 = vcmp.eq.s32.totalorder %v3270_v54, 2  ;;  %vm3271_vm13 = vcmp.lt.s32.totalorder %v3270_v54, 2 }
0x1550   : > { %v4290_v16 = vadd.s32 4294967294, %v3140_v15 }
0x1552   : > { %vm4291_vm8 = vcmp.lt.s32.totalorder %v4290_v16, 0 }
0x1553   : > { %v3143_v17 = vsel %vm4291_vm8, 0, %v4290_v16  ;;  %vm3272_vm8 = vcmp.eq.s32.totalorder %v3270_v54, 0 }
0x1554   : > { %v3148_v18 = vsub.s32 4294967266, %v3143_v17  ;;  %v3144_v25 = vsub.s32 32, %v3143_v17  ;;  %v3145_v27 = vshll.u32 %v3136_v9, %v3143_v17 }
0x1556   : > { %v3149_v22 = vadd.s32 127, %v3148_v18  ;;  %v3146_v2 = vshrl.u32 %v3128_v23, %v3144_v25 }
0x1558   : > { %v3150_v26 = vshll.u32 %v3149_v22, 23  ;;  %v3147_v45 = vor.u32 %v3146_v2, %v3145_v27 }
0x155a   : > { %v3151_v12 = vor.u32 4788187, %v3150_v26  ;;  %v3154_v29 = vcvt.s32.f32 %v3147_v45 }
0x155c   : > { %v3152_v28 = vand.u32 2147483647, %v3151_v12 }
0x155e   : > { %v3155_v13 = vmul.f32 %v3154_v29, %v3152_v28 }
0x1560   : > { %v3156_v30 = vxor.u32 2147483648, %v3155_v13 }
0x1562   : > { %v3157_v31 = vsel %vm3074_vm4, %v3156_v30, %v3155_v13  ;;  %vm3164_vm4 = vweird.f32 %v5825_v7 }
0x1563   : > { %v3160_v32 = vsel %vm3073_vm9, %v5825_v7, %v3157_v31  ;;  %vm6018_vm9 = vcmask 56320  }
0x1564   : > { %4850 = vcosq.f32 %v3160_v32 }
0x1565   : > { %4852 = vsinq.f32 %v3160_v32 }
0x1571   : > { %v4851_v37 = vpop.eup %4850 }
0x1572   : > { %v4853_v41 = vpop.eup %4852  ;;  %v3171_v44 = vxor.u32 2147483648, %v4851_v37 }
0x1573   : > { %v3168_v56 = vxor.u32 2147483648, %v4853_v41 }
0x1574   : > { %v3172_v14 = vsel %vm3170_vm6, %v3171_v44, %v4853_v41  ;;  %v3277_v60 = vsel %vm3275_vm15, %v3171_v44, %v4853_v41  ;;  %vm6017_vm15 = vcmask 1046528  }
0x1575   : > { %v3169_v58 = vsel %vm3167_vm7, %v4851_v37, %v3168_v56  ;;  %v3274_v46 = vsel %vm3272_vm8, %v4851_v37, %v3168_v56  ;;  %vm6021_vm7 = vcmask 39936  }
0x1576   : > { %v3173_v47 = vsel %vm3166_vm14, %v3169_v58, %v3172_v14  ;;  %v3278_v62 = vsel %vm3271_vm13, %v3274_v46, %v3277_v60  ;;  %v3614_v58 = vld [vmem:[#allocation12] sm:$0x1] }
0x1577   : > { %v3174_v8 = vsel %vm3164_vm4, nan, %v3173_v47  ;;  %v3279_v49 = vsel %vm3164_vm4, nan, %v3278_v62 }
0x159d   : > { %v3068_v48 = vpop.f32.mrf.mxu0 }
0x159e   : > { %v3175_v50 = vmul.f32 %v3174_v8, %v3068_v48  ;;  %v3280_v51 = vmul.f32 %v3279_v49, %v3068_v48 }
0x159f   : > { %v4636_v52 = vpop.f32.mrf.mxu0 }
0x15a0   : > { %4642 = vmatmul.mubr.msk.f32.vlgmr.msra.gmra.mxu1 %vm1004_vm5, %v3175_v50  ;;  %4649 = vmatmul.mubr.msk.f32.vlgmr.msra.gmra.mxu0 %vm1004_vm5, %v3280_v51 }
0x15a1   : > { %4652 = vmatpush3.msra.mxu1 %v5771_v38  ;;  %4659 = vmatpush3.msra.mxu0 %v5812_v5 }
0x15a2   : > { %4653 = vmatprep.subr.mxu1 %v5143_v0  ;;  %4660 = vmatprep.subr.mxu0 %v5143_v0 }
0x15a3   : > { %4654 = vmatpush3.msra.mxu1 %v5780_v21  ;;  %4655 = vmatprep.mubr.msk.f32.mxu1 %vm5146_vm1, %v5143_v0 }
0x15a4   : > { %4661 = vmatpush3.msra.mxu0 %v5821_v6  ;;  %4662 = vmatprep.mubr.msk.f32.mxu0 %vm5146_vm1, %v5143_v0 }
0x15a5   : > { %4656 = vmatmul.mubr.msk.f32.vlgmr.msra.gmra.mxu1 %vm1004_vm5, %v3280_v51  ;;  %4663 = vmatmul.mubr.msk.f32.vlgmr.msra.gmra.mxu0 %vm1004_vm5, %v3175_v50 }
0x15a6   : > { %4665 = vmatprep.subr.mxu1 %v5143_v0  ;;  %4667 = vmatprep.mubr.msk.f32.mxu1 %vm5146_vm1, %v5143_v0 }
0x15a7   : > { %4670 = vmatprep.subr.mxu0 %v5143_v0  ;;  %4674 = vmatprep.mubr.msk.f32.mxu0 %vm5146_vm1, %v5143_v0 }
0x15a8   : > { %4671 = vmatpush3.msk.msra.mxu0 %vm842_vm0, %v5144_v1 }
0x15a9   : > { %4672 = vmatprep.subr.mxu0 %v5143_v0 }
0x1660   : > { %v3350_v38 = vpop.f32.mrf.mxu1  ;;  %v3423_v21 = vpop.f32.mrf.mxu0 }
0x1661   : > { %v3427_v7 = vsub.f32 %v3350_v38, %v3423_v21 }
0x1662   : > { %v4643_v5 = vpop.f32.mrf.mxu1  ;;  %v4650_v6 = vpop.f32.mrf.mxu0 }
0x1663   : > { %v3568_v61 = vmul.f32 %v3427_v7, %v3427_v7 }
0x1665   : > { %v3494_v53 = vpop.f32.mrf.mxu1  ;;  %v3564_v55 = vpop.f32.mrf.mxu0 }
0x1666   : > { %v3565_v57 = vadd.f32 %v3564_v55, %v3494_v53  ;;  %v3710_v53 = vld [vmem:[#allocation13] sm:$0xf] }
0x1667   : > { %v4657_v24 = vpop.f32.mrf.mxu1  ;;  %v4664_v59 = vpop.f32.mrf.mxu0 }
0x1668   : > { %v3569_v63 = vmul.f32 %v3565_v57, %v3565_v57  ;;  %v3786_v57 = vld [vmem:[%s5973_s20] sm:$0xff] }
0x166a   : > { %v3570_v3 = vadd.f32 %v3569_v63, %v3568_v61 }
0x166c   : > { %4854 = vrsqrt.f32 %v3570_v3  ;;  %vm3573_vm13 = vcmp.eq.f32.partialorder %v3570_v3, inf  ;;  %v3576_v10 = vand.u32 2147483648, %v3570_v3  ;;  %vm3575_vm14 = vcmp.eq.f32.partialorder %v3570_v3, 0.0 }
0x1679   : > { %v4855_v4 = vpop.eup %4854 }
0x167a   : > { %v3572_v9 = vmul.f32 %v4855_v4, %v3570_v3 }
0x167c   : > { %v3574_v11 = vsel %vm3573_vm13, %v3570_v3, %v3572_v9 }
0x167d   : > { %v3577_v15 = vsel %vm3575_vm14, %v3576_v10, %v3574_v11 }
0x167e   : > { %v3578_v16 = vmul.f32 0.0625, %v3577_v15 }
0x1680   : > { %v3579_v17 = vsub.f32 %v3578_v16, %v5733_v20 }
0x1682   : > { %v3580_v18 = vsel %vm1004_vm5, %v3579_v17, 0.0  ;;  %v3588_v22 = vsel %vm1004_vm5, %v3579_v17, -inf }
0x1683   : > { %v3581_v23 = vrot.slane %v3580_v18, 4  ;;  %v3589_v25 = vrot.slane %v3588_v22, 4 }
0x1685   : > { %v3582_v26 = vadd.f32 %v3581_v23, %v3580_v18  ;;  %v3590_v27 = vmax.f32 %v3588_v22, %v3589_v25  ;;  %v3970_v18 = vld [vmem:[%s5975_s22 + $0x10] sm:$0x1]  ;;  %v3969_v22 = vld [vmem:[%s5975_s22 + $0x8] sm:$0xff] }
0x1687   : > { %v3583_v2 = vrot.slane %v3582_v26, 2  ;;  %v3591_v12 = vrot.slane %v3590_v27, 2 }
0x1689   : > { %v3584_v45 = vadd.f32 %v3583_v2, %v3582_v26  ;;  %v3592_v28 = vmax.f32 %v3590_v27, %v3591_v12  ;;  %v3893_v2 = vld [vmem:[#allocation15] sm:$0x1]  ;;  %v3968_v12 = vld [vmem:[%s5975_s22] sm:$0xff] }
0x168b   : > { %v3585_v29 = vrot.slane %v3584_v45, 1  ;;  %v3593_v13 = vrot.slane %v3592_v28, 1 }
0x168d   : > { %v3586_v30 = vadd.f32 %v3585_v29, %v3584_v45  ;;  %v3594_v32 = vmax.f32 %v3592_v28, %v3593_v13 }
0x168f   : > { %v3587_v31 = vmul.f32 0.125, %v3586_v30 }
0x1691   : > { %v3595_v33 = vsel %vm842_vm0, %v3587_v31, %v3594_v32 }
0x1692   : > { %3597 = vrot.lane.b32.xlu1 %v3595_v33, %s5145_s6 }
0x1704   : > { %v3598_v34 = vpop.permute.xlu1 %3597 }
0x1705   : > { %v3600_v35 = vsel %vm826_vm2, 0.0, %v3598_v34 }
0x1706   : > { %v3601_v36 = vsel %vm828_vm3, %v3600_v35, 0.0 }
0x1707   : > { %v3603_v37 = vrot.slane %v3601_v36, 6  ;;  %v3607_v41 = vrot.slane %v3601_v36, 4 }
0x1709   : > { %3608 = vrot.lane.b32.xlu1 %v3607_v41, %s5148_s2  ;;  %3604 = vrot.lane.b32.xlu0 %v3603_v37, %s5147_s7 }
0x177b   : > { %v3609_v39 = vpop.permute.xlu1 %3608  ;;  %v3605_v54 = vpop.permute.xlu0 %3604 }
0x177c   : > { %v3611_v56 = vsel %vm2082_vm10, %v3601_v36, %v3605_v54  ;;  %vm6019_vm10 = vcmask 72704   ;;  %v4057_v36 = vand.u32 127, %v2172_v40 }
0x177d   : > { %v3612_v44 = vsel %vm2084_vm11, %v3611_v56, %v3609_v39 }
0x177e   : > { %v3613_v14 = vsel %vm2086_vm12, %v3612_v44, 1.0  ;;  %vm6020_vm12 = vcmask 1044480  }
0x177f   : > { %4666 = vmatpush3.msk.msra.mxu1 %vm6017_vm15, %v3613_v14 }
0x1780   : > { %4668 = vmatmul.mubr.msk.f32.vlgmr.msra.gmra.mxu1 %vm6018_vm9, %v3614_v58  ;;  %4677 = vmatprep.subr.mxu1 %v5143_v0 }
0x1781   : > { %4679 = vmatprep.mubr.msk.f32.mxu1 %vm5146_vm1, %v5143_v0 }
0x1840   : > { %v3687_v46 = vpop.f32.mrf.mxu1 }
0x1841   : > { %v3691_v60 = vsub.f32 0.0, %v3687_v46 }
0x1842   : > { %v4669_v47 = vpop.f32.mrf.mxu1 }
0x1843   : > { %v3692_v62 = vmul.f32 1.442695, %v3691_v60 }
0x1845   : > { %4856 = vpow2.f32 %v3692_v62 }
0x1852   : > { %v4857_v48 = vpop.eup %4856 }
0x1853   : > { %v3694_v8 = vadd.f32 1.0, %v4857_v48 }
0x1855   : > { %4858 = vrcp.f32 %v3694_v8 }
0x1862   : > { %v4859_v49 = vpop.eup %4858 }
0x1863   : > { %v3699_v50 = vrot.slane %v4859_v49, %v2174_v43 }
0x1865   : > { %v3700_v51 = vmul.f32 %v3699_v50, %v3579_v17 }
0x1867   : > { %v3701_v52 = vadd.f32 %v3700_v51, %v5733_v20 }
0x1869   : > { %v3706_v38 = vsel %vm1004_vm5, %v3701_v52, -inf  ;;  %v3702_v21 = vsel %vm1004_vm5, %v3701_v52, 0.0 }
0x186a   : > { %3707 = vmax.xlane.f32.xlu1 %v3706_v38  ;;  %3703 = vadd.xlane.f32.xlu0 %v3702_v21 }
0x18f3   : > { %v3704_v5 = vpop.xlane.xlu0 %3703  ;;  %v3708_v7 = vpop.xlane.xlu1 %3707 }
0x18f4   : > { %v3705_v6 = vmul.f32 0.0625, %v3704_v5 }
0x18f6   : > { %v3709_v55 = vsel %vm826_vm2, %v3705_v6, %v3708_v7 }
0x18f7   : > { %4673 = vmatpush3.msra.mxu0 %v3709_v55 }
0x18f8   : > { %4675 = vmatmul.mubr.msk.f32.vlgmr.msra.gmra.mxu0 %vm6019_vm10, %v3710_v53  ;;  %4682 = vmatprep.subr.mxu0 %v5143_v0 }
0x18f9   : > { %4683 = vmatpush3.msk.msra.mxu0 %vm842_vm0, %v5144_v1  ;;  %4690 = vmatprep.mubr.msk.f32.mxu0 %vm5146_vm1, %v5143_v0 }
0x18fa   : > { %4684 = vmatprep.subr.mxu0 %v5143_v0 }
0x19b8   : > { %v3780_v42 = vpop.f32.mrf.mxu0 }
0x19b9   : > { %v3784_v43 = vmax.f32 %v3780_v42, 0.0 }
0x19ba   : > { %v4676_v20 = vpop.f32.mrf.mxu0 }
0x19bb   : > { %v3785_v24 = vsel %vm2084_vm11, %v3784_v43, 1.0 }
0x19bc   : > { %4678 = vmatpush3.msk.msra.mxu1 %vm6020_vm12, %v3785_v24 }
0x19bd   : > { %4680 = vmatmul.mubr.msk.f32.vlgmr.msra.gmra.mxu1 %vm6021_vm7, %v3786_v57  ;;  %4693 = vmatprep.subr.mxu1 %v5143_v0 }
0x19be   : > { %4699 = vmatprep.mubr.msk.f32.mxu1 %vm5146_vm1, %v5143_v0  ;;  %4694 = vmatpush3.msk.msra.mxu1 %vm842_vm0, %v3970_v18  ;;  %vm6022_vm0 = vcmask 203776   ;;  %vm4060_vm1 = vcmp.eq.s32.totalorder %v4057_v36, 2 }
0x19bf   : > { %4695 = vmatprep.subr.mxu1 %v5143_v0  ;;  %v4061_v56 = vsel %vm4060_vm1, 1.0, %v5143_v0 }
0x19c0   : > { %4696 = vmatpush3.msra.mxu1 %v3969_v22 }
0x19c1   : > { %4697 = vmatprep.subr.mxu1 %v5143_v0 }
0x19c2   : > { %4698 = vmatpush3.msra.mxu1 %v3968_v12 }
0x1a7d   : > { %v3859_v1 = vpop.f32.mrf.mxu1 }
0x1a7e   : > { %3864 = vrot.lane.b32.xlu0 %v3859_v1, %s5147_s7 }
0x1a7f   : > { %v4681_v59 = vpop.f32.mrf.mxu1 }
0x1af0   : > { %v3865_v61 = vpop.permute.xlu0 %3864 }
0x1af1   : > { %v3867_v63 = vadd.f32 %v3865_v61, %v3859_v1 }
0x1af3   : > { %v3868_v3 = vsub.f32 0.0, %v3867_v63 }
0x1af5   : > { %v3869_v4 = vmul.f32 1.442695, %v3868_v3 }
0x1af7   : > { %4860 = vpow2.f32 %v3869_v4 }
0x1b04   : > { %v4861_v9 = vpop.eup %4860 }
0x1b05   : > { %v3871_v10 = vadd.f32 1.0, %v4861_v9 }
0x1b07   : > { %4862 = vrcp.f32 %v3871_v10 }
0x1b14   : > { %v4863_v11 = vpop.eup %4862 }
0x1b15   : > { %3875 = vperm.xlu1 %4822, %v4863_v11  }
0x1b90   : > { %v3876_v15 = vpop.permute.xlu1 %3875 }
0x1b91   : > { %v3878_v16 = vmul.f32 %v3876_v15, %v3701_v52 }
0x1b93   : > { %v3879_v17 = vadd.f32 %v3878_v16, %v5679_v19 }
0x1b95   : > { %3881 = vrot.lane.b32.xlu0 %v3879_v17, %s5145_s6 }
0x1c07   : > { %v3882_v23 = vpop.permute.xlu0 %3881 }
0x1c08   : > { %v3884_v19 = vsel %vm826_vm2, 0.0, %v3882_v23  ;;  %vm4058_vm2 = vcmp.eq.s32.totalorder %v4057_v36, 0 }
0x1c09   : > { %v3885_v25 = vsel %vm828_vm3, %v3884_v19, 0.0 }
0x1c0a   : > { %3887 = vrot.lane.b32.xlu0 %v3885_v25, %s5147_s7  ;;  %3890 = vrot.lane.b32.xlu1 %v3885_v25, %s5148_s2 }
0x1c7c   : > { %v3891_v26 = vpop.permute.xlu1 %3890  ;;  %v3888_v27 = vpop.permute.xlu0 %3887 }
0x1c7d   : > { %4685 = vmatpush3.msra.mxu0 %v3891_v26 }
0x1c7e   : > { %4686 = vmatprep.subr.mxu0 %v5143_v0 }
0x1c7f   : > { %4687 = vmatpush3.msra.mxu0 %v3888_v27 }
0x1c80   : > { %4688 = vmatprep.subr.mxu0 %v5143_v0 }
0x1c81   : > { %4689 = vmatpush3.msk.msra.mxu0 %vm828_vm3, %v3884_v19 }
0x1c82   : > { %4691 = vmatmul.mubr.msk.f32.vlgmr.msra.gmra.mxu0 %vm6022_vm0, %v3893_v2 }
0x1d42   : > { %v3963_v45 = vpop.f32.mrf.mxu0 }
0x1d43   : > { %v3967_v28 = vsel %vm1004_vm5, %v3963_v45, 1.0 }
0x1d44   : > { %4700 = vmatmul.mubr.msk.f32.vlgmr.msra.gmra.mxu1 %vm828_vm3, %v3967_v28  ;;  %v4692_v29 = vpop.f32.mrf.mxu0  ;;  %vm4063_vm3 = vcmask 24576  }
0x1e04   : > { %v4043_v13 = vpop.f32.mrf.mxu1 }
0x1e05   : > { %v4048_v30 = vand.u32 2147483647, %v4043_v13  ;;  %v4047_v41 = vmax.f32 %v4043_v13, 0.0 }
0x1e06   : > { %v4701_v31 = vpop.f32.mrf.mxu1 }
0x1e07   : > { %v4049_v32 = vsub.f32 0.0, %v4048_v30 }
0x1e09   : > { %v4050_v33 = vmul.f32 1.442695, %v4049_v32 }
0x1e0b   : > { %4864 = vpow2.f32 %v4050_v33 }
0x1e18   : > { %v4865_v34 = vpop.eup %4864 }
0x1e19   : > { %v4052_v35 = vadd.f32 1.0, %v4865_v34 }
0x1e1b   : > { %4866 = vlog2.f32 %v4052_v35 }
0x1e28   : > { %v4867_v37 = vpop.eup %4866 }
0x1e29   : > { %v4054_v39 = vmul.f32 0.6931472, %v4867_v37 }
0x1e2b   : > { %v4055_v54 = vadd.f32 %v4054_v39, %v4047_v41 }
0x1e2d   : > { %v4059_v44 = vsel %vm4058_vm2, %v4043_v13, %v4055_v54 }
0x1e2e   : > { %v4062_v58 = vadd.f32 %v4061_v56, %v4059_v44 }
0x1e30   : > { %4064 = vst.msk [vmem:[%s816_s29] sm:$0x1] %vm4063_vm3, %v4062_v58 }
0x1e31 PF: > { %s38_s4 = sadd.s32 1, %s5132_s4  }
0x1e32   : > { %p35_p8 = scmp.ge.s32.totalorder %s38_s4, 4  }
0x1e34   :  { %37 = sbr.rel (!%p35_p8) target bundleno = 14 (0xe), region = 179 }
0x1e39   :  { %4082 = vsyncpa [#allocation3], 1 }
0x1e3a   :  { %4084 = vsyncpa [#allocation3 + $0x1], 1 }
0x1e3b   :  { %4085 = vsyncpa [#allocation5], 1 }
0x1e3c   :  { %4086 = vsyncpa [#allocation8], 1 }
0x1e3d   :  { %4087 = vsyncpa [#allocation11], 1 }
0x1e3e   :  { %4088 = vsyncpa [#allocation14], 1 }

</bundles_post_ra>
